<compile_context>
chip_gen: v7x
topology: tpu7x:2x2x1
jax: 0.10.0
libtpu: 0.0.40
codegen_flags: <defaults>
</compile_context>

<pallas_src>
import functools

import numpy as np
import jax
import jax.numpy as jnp
from jax.experimental import pallas as pl
from jax.experimental.pallas import tpu as pltpu


# --------------------------------------------------------------------------
# Deterministic "weights": the 3x3x3 structuring element built in __init__
# of both _AddLesions and _ResizeLabels (6-connectivity cross).
# --------------------------------------------------------------------------
def make_structuring_element() -> np.ndarray:
    se = np.zeros((3, 3, 3), dtype=np.float32)
    se[np.array([1, 1, 2, 0, 1, 1, 1]),
       np.array([1, 1, 1, 1, 1, 0, 2]),
       np.array([1, 2, 1, 1, 0, 1, 1])] = 1.0
    return se


_SE = make_structuring_element()
# Non-zero taps of the SE as (dz, dy, dx) offsets.  For a *binary* mask,
# (conv(x, SE) > 0) == OR over these shifted copies, so dilate_binary_mask
# reduces to a max-chain over 7 shifts (exact, no multiplies, no threshold).
_SE_OFFSETS = tuple(
    (int(z) - 1, int(y) - 1, int(x) - 1) for z, y, x in zip(*np.nonzero(_SE))
)


# --------------------------------------------------------------------------
# In-kernel helpers (traced inside the Pallas kernels)
# --------------------------------------------------------------------------
def _shift(v, off, axis):
    """y[i] = v[i + off] along `axis`, zero padded (== conv padding=1)."""
    if off == 0:
        return v
    n = v.shape[axis]
    sl = [slice(None)] * v.ndim
    zshape = list(v.shape)
    zshape[axis] = abs(off)
    zeros = jnp.zeros(zshape, v.dtype)
    if off > 0:
        sl[axis] = slice(off, n)
        return jnp.concatenate([v[tuple(sl)], zeros], axis=axis)
    sl[axis] = slice(0, n + off)
    return jnp.concatenate([zeros, v[tuple(sl)]], axis=axis)


def _dilate_binary(v):
    """dilate_binary_mask(x, conv, n=1) for a binary mask == max over the
    shifted copies at the non-zero SE taps."""
    out = jnp.zeros_like(v)
    for dz, dy, dx in _SE_OFFSETS:
        s = v
        if dz:
            s = _shift(s, dz, 0)
        if dy:
            s = _shift(s, dy, 1)
        if dx:
            s = _shift(s, dx, 2)
        out = jnp.maximum(out, s)
    return out


# --------------------------------------------------------------------------
# Pallas kernels
# --------------------------------------------------------------------------
def _adjacency_kernel(labels_ref, x_ref, adj_ref):
    """_ResizeLabels._is_adjacent fused: sum(dilate(x==l1) * dilate(x==l2))."""
    x = x_ref[...]
    m1 = _dilate_binary(jnp.where(x == labels_ref[0], 1.0, 0.0).astype(jnp.float32))
    m2 = _dilate_binary(jnp.where(x == labels_ref[1], 1.0, 0.0).astype(jnp.float32))
    adj_ref[0] = jnp.sum(m1 * m2)


def _shift_boundary_kernel(grow, scal_ref, x_ref, trg_ref, rnd1_ref, rnd2_ref,
                           xo_ref, trgo_ref, sum_ref):
    """Fused _ResizeLabels inner step:
       nbr_mask = (x == neighbor); boundary shift (dropout + volume cap);
       relabel x; emit sum(new target mask) as an SMEM scalar."""
    label = scal_ref[0]
    neighbor = scal_ref[1]
    dropout_rate = scal_ref[2]
    max_change = scal_ref[3]                     # abs(change_remaining)

    x = x_ref[...]
    trg = trg_ref[...]
    nbr = jnp.where(x == neighbor, 1.0, 0.0).astype(jnp.float32)
    if grow:                                     # target label grows
        m1, m2, relabel = trg, nbr, label
    else:                                        # target label shrinks
        m1, m2, relabel = nbr, trg, neighbor

    dil = _dilate_binary(m1) * m2
    # boundary dropout (apply_dropout=True -> dropout_rate > 0); uniforms are
    # precomputed on device and streamed in (portable replacement for the
    # hardware PRNG, which has no interpret-mode lowering).
    dil = jnp.where(rnd1_ref[...] >= dropout_rate, dil, 0.0)

    # cap the induced volume change at |max_vol_change| (guarded divisions)
    s_m2 = jnp.sum(m2)
    s_dil = jnp.sum(dil)
    vol_change = jnp.where(s_m2 > 0.0, s_dil / jnp.maximum(s_m2, 1.0), 0.0)
    dr2 = jnp.where(vol_change > max_change,
                    (vol_change - max_change) / jnp.maximum(vol_change, 1e-20),
                    0.0)
    # when the cap doesn't fire dr2 == 0 and this select is a no-op
    dil = jnp.where(rnd2_ref[...] >= dr2, dil, 0.0)

    m1n = m1 + dil
    m2n = m2 - dil
    trg_new = m1n if grow else m2n

    xo_ref[...] = jnp.where(m1n > 0.0, relabel, x)
    trgo_ref[...] = trg_new
    sum_ref[0] = jnp.sum(trg_new)


# --------------------------------------------------------------------------
# Thin (jitted) JAX wrappers around the kernels
# --------------------------------------------------------------------------
_VMEM = pl.BlockSpec(memory_space=pltpu.MemorySpace.VMEM)
_SMEM = pl.BlockSpec(memory_space=pltpu.MemorySpace.SMEM)


def _compiler_params(shape):
    vol_bytes = int(np.prod(shape)) * 4
    # ~8 live (D,H,W) f32 arrays in the fused shift kernel + slack.
    vmem = int(min(100 * 1024 * 1024, max(16 * 1024 * 1024, 12 * vol_bytes)))
    return pltpu.CompilerParams(vmem_limit_bytes=vmem)


@jax.jit
def _adjacency_call(labels, x):
    return pl.pallas_call(
        _adjacency_kernel,
        out_shape=jax.ShapeDtypeStruct((1,), jnp.float32),
        in_specs=[_SMEM, _VMEM],
        out_specs=_SMEM,
        compiler_params=_compiler_params(x.shape),
    )(labels, x)


@functools.partial(jax.jit, static_argnames=("grow",))
def _shift_boundary_call(scal, x, trg, key, *, grow):
    k1, k2 = jax.random.split(key)
    rnd1 = jax.random.uniform(k1, x.shape, jnp.float32)
    rnd2 = jax.random.uniform(k2, x.shape, jnp.float32)
    kern = functools.partial(_shift_boundary_kernel, grow)
    return pl.pallas_call(
        kern,
        out_shape=(jax.ShapeDtypeStruct(x.shape, jnp.float32),   # x_new
                   jax.ShapeDtypeStruct(x.shape, jnp.float32),   # trg_new
                   jax.ShapeDtypeStruct((1,), jnp.float32)),     # sum(trg_new)
        in_specs=[_SMEM, _VMEM, _VMEM, _VMEM, _VMEM],
        out_specs=(_VMEM, _VMEM, _SMEM),
        input_output_aliases={1: 0, 2: 1},        # x -> x_new, trg -> trg_new
        compiler_params=_compiler_params(x.shape),
    )(scal, x, trg, rnd1, rnd2)


def is_adjacent(x, label1, label2):
    labels = jnp.asarray([label1, label2], dtype=jnp.float32)
    return bool(_adjacency_call(labels, x)[0] > 0.0)


def shift_label_boundary(x, trg_mask, label, neighbor, dropout_rate,
                         change_remaining, grow, key):
    scal = jnp.asarray(
        [label, neighbor, dropout_rate, abs(change_remaining)], jnp.float32)
    x_new, trg_new, trg_sum = _shift_boundary_call(
        scal, x, trg_mask, key, grow=bool(grow))
    return x_new, trg_new, float(trg_sum[0])


# --------------------------------------------------------------------------
# Glue replicating _ResizeLabels / _AddLesions control flow
# --------------------------------------------------------------------------
def _resize_labels(x, sdict, dropout_rate, key):
    # NOTE: the reference `_resize_labels` returns inside the per-label loop,
    # so only the FIRST entry of sdict is ever processed; reproduced here.
    label = float(next(iter(sdict)))
    first = next(iter(sdict))
    target_vol_change = float(sdict[first][0])
    nbr_list = [float(n) for n in sdict[first][1:]
                if is_adjacent(x, label, float(n))]

    trg_mask = jnp.where(x == label, 1.0, 0.0).astype(jnp.float32)
    trg_orig_sum = float(jnp.sum(trg_mask))
    grow = target_vol_change >= 0.0
    vol_change = 0.0
    it = 0
    # TODO(synk): data-dependent while-loop termination requires a host sync
    # per iteration (mirrors `.item()` in the PyTorch code); only one scalar
    # crosses the host/device boundary per step now.
    while abs(vol_change) < abs(target_vol_change) and it < 20:
        if not nbr_list or trg_orig_sum <= 0.0:
            break
        change_remaining = target_vol_change - vol_change
        trg_sum = trg_orig_sum
        for neighbor in nbr_list:
            key, sub = jax.random.split(key)
            x, trg_mask, trg_sum = shift_label_boundary(
                x, trg_mask, label, neighbor, dropout_rate,
                change_remaining, grow, sub)
        vol_change = (trg_sum - trg_orig_sum) / trg_orig_sum
        it += 1
    return x


class AddLesionsPallas:
    """JAX/Pallas equivalent of _AddLesions.forward."""

    def __init__(self, in_shape, lesions_label=77, chance=0.5, max_n_lesions=1,
                 bg_labels=(2, 41), bg_buffer=3, max_lesions_vol=20.0, seed=0):
        self.in_shape = in_shape
        self.lesions_label = float(lesions_label)
        self.chance = chance
        self.max_n_lesions = max_n_lesions
        self.bg_labels = [float(b) for b in bg_labels]
        self.bg_buffer = bg_buffer                   # unused by forward (parity)
        self.max_lesions_vol = max_lesions_vol
        self.dropout_rate = 0.2                      # _ResizeLabels(apply_dropout=True)
        self.structuring_element = _SE               # deterministic conv weights
        self.rng = np.random.default_rng(seed)
        self._key = jax.random.PRNGKey(seed)

    def _next_key(self):
        self._key, sub = jax.random.split(self._key)
        return sub

    def _insert_lesions(self, x):
        M = jnp.zeros(x.shape, jnp.float32)
        for bg in self.bg_labels:
            M = jnp.where(x == bg, 1.0, M)
        # TODO(synk): data-dependent seed-voxel selection (torch.where index
        # gather) runs on the host, one full-volume D2H per forward call.
        bg_idx = np.stack(np.nonzero(np.asarray(M) > 0.0))          # (3, n_bg)
        n_bg = bg_idx.shape[1]
        n_lesions = int(self.rng.integers(1, self.max_n_lesions + 1))
        cols = np.asarray(self.rng.integers(0, n_bg, size=(n_lesions,)))
        seed_vox = bg_idx[:, cols]
        lesion_vals = jnp.arange(2, n_lesions + 2, dtype=jnp.float32)
        M = M.at[tuple(seed_vox)].set(lesion_vals)
        lesions_sdict = {n + 2: [float(self.rng.uniform(0.0, self.max_lesions_vol)), 1]
                         for n in range(n_lesions)}
        M = _resize_labels(M, lesions_sdict, self.dropout_rate, self._next_key())
        return jnp.where(M > 1.0, self.lesions_label, x)

    def __call__(self, x):
        if float(self.rng.uniform(0.0, 1.0)) <= self.chance:
            x = self._insert_lesions(x)
        return x


# --------------------------------------------------------------------------
if __name__ == "__main__":
    D = H = W = 16
    key = jax.random.PRNGKey(0)
    base = jax.random.randint(key, (D, H, W), 0, 3)
    label_lut = jnp.asarray([0.0, 3.0, 41.0], dtype=jnp.float32)
    x = label_lut[base]
    # guarantee a contiguous background (label 2) region to host lesions
    x = x.at[4:12, 4:12, 4:12].set(2.0)

    add_lesions = AddLesionsPallas(
        in_shape=(1, 1, D, H, W), lesions_label=77, chance=1.0,
        max_n_lesions=2, bg_labels=(2, 41), max_lesions_vol=20.0, seed=0)

    y = add_lesions(x)
    y = jax.block_until_ready(y)

    assert y.shape == x.shape and y.dtype == x.dtype
    assert int(jnp.sum(y == 77.0)) >= 1           # lesions were inserted
    print("KERNEL_OK")
</pallas_src>

<mosaic_0001>
module attributes {stable_mosaic.version = 11 : i64} {
  func.func @_adjacency_kernel(%arg0: memref<2xf32, #tpu.memory_space<smem>>, %arg1: memref<16x16x16xf32, #tpu.memory_space<vmem>>, %arg2: memref<1xf32, #tpu.memory_space<smem>>) attributes {dimension_semantics = [], scalar_prefetch = 0 : i64, scratch_operands = 0 : i64, tpu.core_type = #tpu.core_type<tc>} {
    %c0 = arith.constant 0 : index
    %c0_0 = arith.constant 0 : index
    %c0_1 = arith.constant 0 : index
    %0 = vector.load %arg1[%c0, %c0_0, %c0_1] : memref<16x16x16xf32, #tpu.memory_space<vmem>>, vector<16x16x16xf32>
    %c0_2 = arith.constant 0 : index
    %1 = memref.load %arg0[%c0_2] : memref<2xf32, #tpu.memory_space<smem>>
    %2 = vector.broadcast %1 : f32 to vector<16x16x16xf32>
    %3 = arith.cmpf oeq, %0, %2 : vector<16x16x16xf32>
    %cst = arith.constant 1.000000e+00 : f32
    %cst_3 = arith.constant 0.000000e+00 : f32
    %4 = vector.broadcast %cst : f32 to vector<16x16x16xf32>
    %5 = vector.broadcast %cst_3 : f32 to vector<16x16x16xf32>
    %6 = arith.select %3, %4, %5 : vector<16x16x16xi1>, vector<16x16x16xf32>
    %cst_4 = arith.constant 0.000000e+00 : f32
    %7 = vector.broadcast %cst_4 : f32 to vector<16x16x16xf32>
    %cst_5 = arith.constant 0.000000e+00 : f32
    %8 = vector.broadcast %cst_5 : f32 to vector<1x16x16xf32>
    %9 = vector.extract_strided_slice %6 {offsets = [0, 0, 0], sizes = [15, 16, 16], strides = [1, 1, 1]} : vector<16x16x16xf32> to vector<15x16x16xf32>
    %10 = tpu.concatenate %8, %9 in 0 : vector<1x16x16xf32>, vector<15x16x16xf32> -> vector<16x16x16xf32>
    %11 = arith.maximumf %7, %10 : vector<16x16x16xf32>
    %cst_6 = arith.constant 0.000000e+00 : f32
    %12 = vector.broadcast %cst_6 : f32 to vector<16x1x16xf32>
    %13 = vector.extract_strided_slice %6 {offsets = [0, 0, 0], sizes = [16, 15, 16], strides = [1, 1, 1]} : vector<16x16x16xf32> to vector<16x15x16xf32>
    %14 = tpu.concatenate %12, %13 in 1 : vector<16x1x16xf32>, vector<16x15x16xf32> -> vector<16x16x16xf32>
    %15 = arith.maximumf %11, %14 : vector<16x16x16xf32>
    %cst_7 = arith.constant 0.000000e+00 : f32
    %16 = vector.broadcast %cst_7 : f32 to vector<16x16x1xf32>
    %17 = vector.extract_strided_slice %6 {offsets = [0, 0, 0], sizes = [16, 16, 15], strides = [1, 1, 1]} : vector<16x16x16xf32> to vector<16x16x15xf32>
    %18 = tpu.concatenate %16, %17 in 2 : vector<16x16x1xf32>, vector<16x16x15xf32> -> vector<16x16x16xf32>
    %19 = arith.maximumf %15, %18 : vector<16x16x16xf32>
    %20 = arith.maximumf %19, %6 : vector<16x16x16xf32>
    %cst_8 = arith.constant 0.000000e+00 : f32
    %21 = vector.broadcast %cst_8 : f32 to vector<16x16x1xf32>
    %22 = vector.extract_strided_slice %6 {offsets = [0, 0, 1], sizes = [16, 16, 15], strides = [1, 1, 1]} : vector<16x16x16xf32> to vector<16x16x15xf32>
    %23 = tpu.concatenate %22, %21 in 2 : vector<16x16x15xf32>, vector<16x16x1xf32> -> vector<16x16x16xf32>
    %24 = arith.maximumf %20, %23 : vector<16x16x16xf32>
    %cst_9 = arith.constant 0.000000e+00 : f32
    %25 = vector.broadcast %cst_9 : f32 to vector<16x1x16xf32>
    %26 = vector.extract_strided_slice %6 {offsets = [0, 1, 0], sizes = [16, 15, 16], strides = [1, 1, 1]} : vector<16x16x16xf32> to vector<16x15x16xf32>
    %27 = tpu.concatenate %26, %25 in 1 : vector<16x15x16xf32>, vector<16x1x16xf32> -> vector<16x16x16xf32>
    %28 = arith.maximumf %24, %27 : vector<16x16x16xf32>
    %cst_10 = arith.constant 0.000000e+00 : f32
    %29 = vector.broadcast %cst_10 : f32 to vector<1x16x16xf32>
    %30 = vector.extract_strided_slice %6 {offsets = [1, 0, 0], sizes = [15, 16, 16], strides = [1, 1, 1]} : vector<16x16x16xf32> to vector<15x16x16xf32>
    %31 = tpu.concatenate %30, %29 in 0 : vector<15x16x16xf32>, vector<1x16x16xf32> -> vector<16x16x16xf32>
    %32 = arith.maximumf %28, %31 : vector<16x16x16xf32>
    %c1 = arith.constant 1 : index
    %33 = memref.load %arg0[%c1] : memref<2xf32, #tpu.memory_space<smem>>
    %34 = vector.broadcast %33 : f32 to vector<16x16x16xf32>
    %35 = arith.cmpf oeq, %0, %34 : vector<16x16x16xf32>
    %cst_11 = arith.constant 1.000000e+00 : f32
    %cst_12 = arith.constant 0.000000e+00 : f32
    %36 = vector.broadcast %cst_11 : f32 to vector<16x16x16xf32>
    %37 = vector.broadcast %cst_12 : f32 to vector<16x16x16xf32>
    %38 = arith.select %35, %36, %37 : vector<16x16x16xi1>, vector<16x16x16xf32>
    %cst_13 = arith.constant 0.000000e+00 : f32
    %39 = vector.broadcast %cst_13 : f32 to vector<16x16x16xf32>
    %cst_14 = arith.constant 0.000000e+00 : f32
    %40 = vector.broadcast %cst_14 : f32 to vector<1x16x16xf32>
    %41 = vector.extract_strided_slice %38 {offsets = [0, 0, 0], sizes = [15, 16, 16], strides = [1, 1, 1]} : vector<16x16x16xf32> to vector<15x16x16xf32>
    %42 = tpu.concatenate %40, %41 in 0 : vector<1x16x16xf32>, vector<15x16x16xf32> -> vector<16x16x16xf32>
    %43 = arith.maximumf %39, %42 : vector<16x16x16xf32>
    %cst_15 = arith.constant 0.000000e+00 : f32
    %44 = vector.broadcast %cst_15 : f32 to vector<16x1x16xf32>
    %45 = vector.extract_strided_slice %38 {offsets = [0, 0, 0], sizes = [16, 15, 16], strides = [1, 1, 1]} : vector<16x16x16xf32> to vector<16x15x16xf32>
    %46 = tpu.concatenate %44, %45 in 1 : vector<16x1x16xf32>, vector<16x15x16xf32> -> vector<16x16x16xf32>
    %47 = arith.maximumf %43, %46 : vector<16x16x16xf32>
    %cst_16 = arith.constant 0.000000e+00 : f32
    %48 = vector.broadcast %cst_16 : f32 to vector<16x16x1xf32>
    %49 = vector.extract_strided_slice %38 {offsets = [0, 0, 0], sizes = [16, 16, 15], strides = [1, 1, 1]} : vector<16x16x16xf32> to vector<16x16x15xf32>
    %50 = tpu.concatenate %48, %49 in 2 : vector<16x16x1xf32>, vector<16x16x15xf32> -> vector<16x16x16xf32>
    %51 = arith.maximumf %47, %50 : vector<16x16x16xf32>
    %52 = arith.maximumf %51, %38 : vector<16x16x16xf32>
    %cst_17 = arith.constant 0.000000e+00 : f32
    %53 = vector.broadcast %cst_17 : f32 to vector<16x16x1xf32>
    %54 = vector.extract_strided_slice %38 {offsets = [0, 0, 1], sizes = [16, 16, 15], strides = [1, 1, 1]} : vector<16x16x16xf32> to vector<16x16x15xf32>
    %55 = tpu.concatenate %54, %53 in 2 : vector<16x16x15xf32>, vector<16x16x1xf32> -> vector<16x16x16xf32>
    %56 = arith.maximumf %52, %55 : vector<16x16x16xf32>
    %cst_18 = arith.constant 0.000000e+00 : f32
    %57 = vector.broadcast %cst_18 : f32 to vector<16x1x16xf32>
    %58 = vector.extract_strided_slice %38 {offsets = [0, 1, 0], sizes = [16, 15, 16], strides = [1, 1, 1]} : vector<16x16x16xf32> to vector<16x15x16xf32>
    %59 = tpu.concatenate %58, %57 in 1 : vector<16x15x16xf32>, vector<16x1x16xf32> -> vector<16x16x16xf32>
    %60 = arith.maximumf %56, %59 : vector<16x16x16xf32>
    %cst_19 = arith.constant 0.000000e+00 : f32
    %61 = vector.broadcast %cst_19 : f32 to vector<1x16x16xf32>
    %62 = vector.extract_strided_slice %38 {offsets = [1, 0, 0], sizes = [15, 16, 16], strides = [1, 1, 1]} : vector<16x16x16xf32> to vector<15x16x16xf32>
    %63 = tpu.concatenate %62, %61 in 0 : vector<15x16x16xf32>, vector<1x16x16xf32> -> vector<16x16x16xf32>
    %64 = arith.maximumf %60, %63 : vector<16x16x16xf32>
    %65 = arith.mulf %32, %64 : vector<16x16x16xf32>
    %66 = vector.shape_cast %65 : vector<16x16x16xf32> to vector<1x16x16x16xf32>
    %cst_20 = arith.constant dense<0.000000e+00> : vector<1xf32>
    %67 = vector.multi_reduction <add>, %66, %cst_20 [1, 2, 3] : vector<1x16x16x16xf32> to vector<1xf32>
    %68 = vector.shape_cast %67 : vector<1xf32> to vector<1x1x1x1xf32>
    %69 = vector.extract %68[0, 0, 0, 0] : f32 from vector<1x1x1x1xf32>
    %c0_21 = arith.constant 0 : index
    %70 = memref.load %arg2[%c0_21] : memref<1xf32, #tpu.memory_space<smem>>
    memref.store %69, %arg2[%c0_21] : memref<1xf32, #tpu.memory_space<smem>>
    return
  }
}

</mosaic_0001>

<bundles_post_ra>
// kernel: _adjacency_call.1
= control target key start
LH: loop header
LB: loop body
LE: loop exit
PB: predicated region body
PF: predicated region fallthrough
CT: control target
= control target key end

     0   :  { %7 = vsyncpa [#allocation4], 0  ;;  %s3618_s0 = inlined_call_operand.hbm [shape: f32[2], index: 0, kind: input, shape index: {}]   ;;  %s3619_s1 = inlined_call_operand.hbm [shape: f32[16,16,16], index: 1, kind: input, shape index: {}]   ;;  %s3620_s2 = inlined_call_operand.hbm [shape: f32[1], index: 2, kind: output, shape index: {}]  }
   0x1   :  { %8 = vsyncpa [#allocation3], 0 }
   0x2   :  { %9 = vsyncpa [#allocation5], 0  ;;  %s2062_s11 = scalar_lea.hbm %s3618_s0, 16 }
   0x3   :  { %p2063_p0 = scmp.ne.s32.totalorder %s3618_s0, %s2062_s11  ;;  %p2066_p1 = scmp.lt.u32.totalorder %s2062_s11, %s3618_s0 }
   0x5   :  { %p2068_p2 = pnand %p2066_p1, %p2063_p0 }
   0x7   :  { %2071 = shalt.err (!%p2068_p2)
}
   0x8   :  { %s2110_s16 = smov [#allocation2]   ;;  %s2111_s19 = smov [#allocation6]  }
   0x9   :  { %17 = dma.hbm_to_smem %s3618_s0, 16, %s2110_s16, [#allocation4]  }
   0xa   :  { %s23_s20 = sshll.u32 %s2111_s19, 4  ;;  %s2072_s23 = scalar_lea.hbm %s3619_s1, 4096  ;;  %s24_s20 = int_to_ptr.vmem [resolvable:$true] %s23_s20 }
   0xb   :  { %p2073_p3 = scmp.ne.s32.totalorder %s3619_s1, %s2072_s23  ;;  %p2076_p4 = scmp.lt.u32.totalorder %s2072_s23, %s3619_s1 }
   0xd   :  { %p2078_p5 = pnand %p2076_p4, %p2073_p3 }
   0xf   :  { %2081 = shalt.err (!%p2078_p5)
}
  0x10   :  { %s2082_s28 = scalar_lea.vmem %s24_s20, 4096  ;;  %p2087_p7 = scmp.lt.s32.totalorder %s24_s20, %s24_s20 }
  0x11   :  { %p2083_p6 = scmp.ne.s32.totalorder %s24_s20, %s2082_s28  ;;  %p2088_p8 = scmp.lt.s32.totalorder %s2082_s28, %s2082_s28 }
  0x13   :  { %p2089_p9 = por %p2088_p8, %p2087_p7 }
  0x15   :  { %p2090_p10 = pnand %p2089_p9, %p2083_p6 }
  0x17   :  { %2093 = shalt.err (!%p2090_p10)
}
  0x18   :  { %s2112_s0 = smov 128   ;;  %s2113_s29 = smov 8  }
  0x19   :  { %29 = dma.hbm_to_vmem [thread:$0]  %s3619_s1, 4096, %s24_s20, [#allocation3], %s2112_s0, %s2112_s0, %s2113_s29  }
  0x1a   :  { %2104 = dma.done.wait [#allocation4], 16  }
  0x1b   :  { %2105 = vsyncadd [#allocation4], 4294967280 }
  0x1c   :  { %2106 = dma.done.wait [#allocation3], 4096  }
  0x1d   :  { %2107 = vsyncadd [#allocation3], 4294963200 }
  0x1e   :  { %36 = sfence }
  0x1f   :  { %s69_s4 = sld [smem:[#allocation2]]  ;;  %s1731_s5 = sld [smem:[#allocation2 + $0x1]]  ;;  %v39_v0 = vld [vmem:[#allocation6 + $0x10] sm:$0xff]  ;;  %v37_v1 = vld [vmem:[#allocation6] sm:$0xff]  ;;  %v38_v2 = vld [vmem:[#allocation6 + $0x8] sm:$0xff]  ;;  %v3669_v6 = vmov 0.0  }
  0x20   :  { %v40_v5 = vld [vmem:[#allocation6 + $0x18] sm:$0xff]  ;;  %v41_v14 = vld [vmem:[#allocation6 + $0x20] sm:$0xff]  ;;  %v42_v15 = vld [vmem:[#allocation6 + $0x28] sm:$0xff]  ;;  %s2115_s1 = smov 1   ;;  %s2116_s6 = smov 127  }
  0x21   :  { %v43_v21 = vld [vmem:[#allocation6 + $0x30] sm:$0xff]  ;;  %v44_v24 = vld [vmem:[#allocation6 + $0x38] sm:$0xff]  ;;  %v45_v25 = vld [vmem:[#allocation6 + $0x40] sm:$0xff]  ;;  %s2094_s10 = scalar_lea.hbm %s3620_s2, 16 }
  0x22   :  { %v46_v31 = vld [vmem:[#allocation6 + $0x48] sm:$0xff]  ;;  %v47_v32 = vld [vmem:[#allocation6 + $0x50] sm:$0xff]  ;;  %v48_v39 = vld [vmem:[#allocation6 + $0x58] sm:$0xff]  ;;  %p2095_p11 = scmp.ne.s32.totalorder %s3620_s2, %s2094_s10  ;;  %p2098_p12 = scmp.lt.u32.totalorder %s2094_s10, %s3620_s2 }
  0x23   :  { %v49_v40 = vld [vmem:[#allocation6 + $0x60] sm:$0xff]  ;;  %v50_v47 = vld [vmem:[#allocation6 + $0x68] sm:$0xff]  ;;  %v51_v48 = vld [vmem:[#allocation6 + $0x70] sm:$0xff] }
  0x24   :  { %v52_v55 = vld [vmem:[#allocation6 + $0x78] sm:$0xff]  ;;  %v53_v56 = vld [vmem:[#allocation6 + $0x80] sm:$0xff]  ;;  %v54_v63 = vld [vmem:[#allocation6 + $0x88] sm:$0xff]  ;;  %p2100_p13 = pnand %p2098_p12, %p2095_p11 }
  0x25   :  { %v2157_v3 = vstv %s69_s4  ;;  %v2160_v4 = vstv %s1731_s5 }
  0x26   :  { %vm73_vm0 = vcmp.eq.f32.partialorder %v39_v0, %v2157_v3  ;;  %vm71_vm1 = vcmp.eq.f32.partialorder %v37_v1, %v2157_v3  ;;  %vm72_vm2 = vcmp.eq.f32.partialorder %v38_v2, %v2157_v3  ;;  %vm845_vm3 = vcmp.eq.f32.partialorder %v39_v0, %v2160_v4  ;;  %v55_v0 = vld [vmem:[#allocation6 + $0x90] sm:$0xff] }
  0x27   :  { %v2165_v7 = vsel %vm73_vm0, 1.0, %v3669_v6  ;;  %v2169_v8 = vsel %vm71_vm1, 1.0, %v3669_v6  ;;  %v2172_v9 = vsel %vm72_vm2, 1.0, %v3669_v6  ;;  %v2175_v10 = vsel %vm845_vm3, 1.0, %v3669_v6 }
  0x28   :  { %vm843_vm4 = vcmp.eq.f32.partialorder %v37_v1, %v2160_v4  ;;  %vm844_vm5 = vcmp.eq.f32.partialorder %v38_v2, %v2160_v4  ;;  %v1742_v11 = vpack.i.bf16 %v2172_v9, %v2169_v8  ;;  %v2183_v12 = vpack.i.bf16 %v2175_v10, %v2165_v7 }
  0x29   :  { %vm74_vm6 = vcmp.eq.f32.partialorder %v40_v5, %v2157_v3  ;;  %vm846_vm7 = vcmp.eq.f32.partialorder %v40_v5, %v2160_v4  ;;  %v2188_v13 = vsel %vm843_vm4, 1.0, %v3669_v6  ;;  %v2198_v18 = vsel %vm844_vm5, 1.0, %v3669_v6 }
  0x2a   :  { %1743 = vrot.lane.b32.xlu0 %v1742_v11, %s2115_s1  ;;  %v2192_v16 = vsel %vm74_vm6, 1.0, %v3669_v6  ;;  %v2195_v17 = vsel %vm846_vm7, 1.0, %v3669_v6  ;;  %1753 = vrot.lane.b32.xlu1 %v2183_v12, %s2115_s1  ;;  %v1747_v20 = vpack.i.bf16 %v2198_v18, %v2188_v13  ;;  %vm75_vm8 = vcmp.eq.f32.partialorder %v41_v14, %v2157_v3 }
  0x2b   :  { %3742 = vst [vmem:[#allocation11_spill] sm:$0xff] %v2192_v16  ;;  %v2204_v19 = vpack.i.bf16 %v2195_v17, %v2192_v16  ;;  %vm847_vm9 = vcmp.eq.f32.partialorder %v41_v14, %v2160_v4  ;;  %vm76_vm10 = vcmp.eq.f32.partialorder %v42_v15, %v2157_v3  ;;  %v2212_v22 = vsel %vm75_vm8, 1.0, %v3669_v6 }
  0x2c   :  { %v2215_v23 = vsel %vm847_vm9, 1.0, %v3669_v6  ;;  %vm848_vm11 = vcmp.eq.f32.partialorder %v42_v15, %v2160_v4  ;;  %v2220_v26 = vsel %vm76_vm10, 1.0, %v3669_v6  ;;  %vm77_vm12 = vcmp.eq.f32.partialorder %v43_v21, %v2157_v3  ;;  %v56_v15 = vld [vmem:[#allocation6 + $0x98] sm:$0xff] }
  0x2d   :  { %3743 = vst [vmem:[#allocation12_spill] sm:$0xff] %v2220_v26  ;;  %v2223_v27 = vsel %vm848_vm11, 1.0, %v3669_v6  ;;  %v2230_v28 = vpack.i.bf16 %v2215_v23, %v2212_v22  ;;  %v2233_v29 = vsel %vm77_vm12, 1.0, %v3669_v6  ;;  %vm849_vm13 = vcmp.eq.f32.partialorder %v43_v21, %v2160_v4 }
  0x2e   :  { %1748 = vrot.lane.b32.xlu0 %v1747_v20, %s2115_s1  ;;  %3744 = vst [vmem:[#allocation13_spill] sm:$0xff] %v2223_v27  ;;  %1758 = vrot.lane.b32.xlu1 %v2204_v19, %s2115_s1  ;;  %v2237_v30 = vsel %vm849_vm13, 1.0, %v3669_v6  ;;  %vm78_vm14 = vcmp.eq.f32.partialorder %v44_v24, %v2157_v3  ;;  %vm850_vm15 = vcmp.eq.f32.partialorder %v44_v24, %v2160_v4 }
  0x2f   :  { %vm79_vm0 = vcmp.eq.f32.partialorder %v45_v25, %v2157_v3  ;;  %v2244_v33 = vpack.i.bf16 %v2223_v27, %v2220_v26  ;;  %v2247_v34 = vsel %vm78_vm14, 1.0, %v3669_v6  ;;  %v2250_v35 = vsel %vm850_vm15, 1.0, %v3669_v6 }
  0x30   :  { %v2255_v36 = vpack.i.bf16 %v2237_v30, %v2233_v29  ;;  %v2258_v37 = vsel %vm79_vm0, 1.0, %v3669_v6  ;;  %vm851_vm1 = vcmp.eq.f32.partialorder %v45_v25, %v2160_v4  ;;  %vm80_vm2 = vcmp.eq.f32.partialorder %v46_v31, %v2157_v3 }
  0x31   :  { %v2263_v38 = vsel %vm851_vm1, 1.0, %v3669_v6  ;;  %vm852_vm3 = vcmp.eq.f32.partialorder %v46_v31, %v2160_v4  ;;  %vm81_vm4 = vcmp.eq.f32.partialorder %v47_v32, %v2157_v3  ;;  %v2270_v41 = vpack.i.bf16 %v2250_v35, %v2247_v34 }
  0x32   :  { %1763 = vrot.lane.b32.xlu0 %v1742_v11, %s2116_s6  ;;  %1768 = vrot.lane.b32.xlu1 %v1747_v20, %s2116_s6  ;;  %v2273_v42 = vsel %vm80_vm2, 1.0, %v3669_v6  ;;  %v2276_v43 = vsel %vm852_vm3, 1.0, %v3669_v6  ;;  %v2280_v44 = vpack.i.bf16 %v2263_v38, %v2258_v37  ;;  %v2283_v45 = vsel %vm81_vm4, 1.0, %v3669_v6 }
  0x33   :  { %3745 = vst [vmem:[#allocation14_spill] sm:$0xff] %v2273_v42  ;;  %3746 = vst [vmem:[#allocation15_spill] sm:$0xff] %v2276_v43  ;;  %vm853_vm5 = vcmp.eq.f32.partialorder %v47_v32, %v2160_v4  ;;  %vm82_vm6 = vcmp.eq.f32.partialorder %v48_v39, %v2157_v3  ;;  %vm854_vm7 = vcmp.eq.f32.partialorder %v48_v39, %v2160_v4  ;;  %v58_v32 = vld [vmem:[#allocation6 + $0xa8] sm:$0xff]  ;;  %v59_v39 = vld [vmem:[#allocation6 + $0xb0] sm:$0xff] }
  0x34   :  { %v2289_v46 = vsel %vm853_vm5, 1.0, %v3669_v6  ;;  %vm83_vm8 = vcmp.eq.f32.partialorder %v49_v40, %v2157_v3  ;;  %v2298_v49 = vpack.i.bf16 %v2276_v43, %v2273_v42  ;;  %v2301_v50 = vsel %vm82_vm6, 1.0, %v3669_v6 }
  0x35   :  { %3747 = vst [vmem:[#allocation16_spill] sm:$0xff] %v2301_v50  ;;  %v2304_v51 = vsel %vm854_vm7, 1.0, %v3669_v6  ;;  %v2308_v52 = vpack.i.bf16 %v2289_v46, %v2283_v45  ;;  %v2311_v53 = vsel %vm83_vm8, 1.0, %v3669_v6  ;;  %vm855_vm9 = vcmp.eq.f32.partialorder %v49_v40, %v2160_v4 }
  0x36   :  { %1773 = vrot.lane.b32.xlu0 %v2230_v28, %s2115_s1  ;;  %1778 = vrot.lane.b32.xlu1 %v2183_v12, %s2116_s6  ;;  %3748 = vst [vmem:[#allocation17_spill] sm:$0xff] %v2304_v51  ;;  %3749 = vst [vmem:[#allocation18_spill] sm:$0xff] %v2311_v53  ;;  %v2315_v54 = vsel %vm855_vm9, 1.0, %v3669_v6  ;;  %vm84_vm10 = vcmp.eq.f32.partialorder %v50_v47, %v2157_v3  ;;  %vm856_vm11 = vcmp.eq.f32.partialorder %v50_v47, %v2160_v4 }
  0x37   :  { %3750 = vst [vmem:[#allocation19_spill] sm:$0xff] %v2315_v54  ;;  %vm85_vm12 = vcmp.eq.f32.partialorder %v51_v48, %v2157_v3  ;;  %v2324_v57 = vpack.i.bf16 %v2304_v51, %v2301_v50  ;;  %v2327_v58 = vsel %vm84_vm10, 1.0, %v3669_v6  ;;  %v2330_v59 = vsel %vm856_vm11, 1.0, %v3669_v6 }
  0x38   :  { %3751 = vst [vmem:[#allocation20_spill] sm:$0xff] %v2327_v58  ;;  %3752 = vst [vmem:[#allocation21_spill] sm:$0xff] %v2330_v59  ;;  %v2336_v60 = vpack.i.bf16 %v2315_v54, %v2311_v53  ;;  %v2339_v61 = vsel %vm85_vm12, 1.0, %v3669_v6  ;;  %vm857_vm13 = vcmp.eq.f32.partialorder %v51_v48, %v2160_v4  ;;  %vm86_vm14 = vcmp.eq.f32.partialorder %v52_v55, %v2157_v3 }
  0x39   :  { %3753 = vst [vmem:[#allocation22_spill] sm:$0xff] %v2339_v61  ;;  %v2343_v62 = vsel %vm857_vm13, 1.0, %v3669_v6  ;;  %vm858_vm15 = vcmp.eq.f32.partialorder %v52_v55, %v2160_v4  ;;  %vm87_vm0 = vcmp.eq.f32.partialorder %v53_v56, %v2157_v3  ;;  %v2350_v1 = vpack.i.bf16 %v2330_v59, %v2327_v58 }
  0x3a   :  { %1783 = vrot.lane.b32.xlu0 %v2244_v33, %s2115_s1  ;;  %1788 = vrot.lane.b32.xlu1 %v2204_v19, %s2116_s6  ;;  %3754 = vst [vmem:[#allocation23_spill] sm:$0xff] %v2343_v62  ;;  %v2353_v2 = vsel %vm86_vm14, 1.0, %v3669_v6  ;;  %v2356_v5 = vsel %vm858_vm15, 1.0, %v3669_v6  ;;  %v2362_v11 = vpack.i.bf16 %v2343_v62, %v2339_v61  ;;  %v2365_v12 = vsel %vm87_vm0, 1.0, %v3669_v6  ;;  %v57_v19 = vld [vmem:[#allocation6 + $0xa0] sm:$0xff] }
  0x3b   :  { %3755 = vst [vmem:[#allocation24_spill] sm:$0xff] %v2353_v2  ;;  %3756 = vst [vmem:[#allocation25_spill] sm:$0xff] %v2356_v5  ;;  %vm859_vm1 = vcmp.eq.f32.partialorder %v53_v56, %v2160_v4  ;;  %vm88_vm2 = vcmp.eq.f32.partialorder %v54_v63, %v2157_v3  ;;  %vm860_vm3 = vcmp.eq.f32.partialorder %v54_v63, %v2160_v4  ;;  %v60_v63 = vld [vmem:[#allocation6 + $0xb8] sm:$0xff]  ;;  %v969_v62 = vrot.slane %v2188_v13, 7 }
  0x3c   :  { %3757 = vst [vmem:[#allocation26_spill] sm:$0xff] %v2365_v12  ;;  %v2371_v14 = vsel %vm859_vm1, 1.0, %v3669_v6  ;;  %vm89_vm4 = vcmp.eq.f32.partialorder %v55_v0, %v2157_v3  ;;  %v2378_v20 = vpack.i.bf16 %v2356_v5, %v2353_v2  ;;  %v2381_v21 = vsel %vm88_vm2, 1.0, %v3669_v6 }
  0x3d   :  { %3758 = vst [vmem:[#allocation27_spill] sm:$0xff] %v2371_v14  ;;  %3759 = vst [vmem:[#allocation28_spill] sm:$0xff] %v2381_v21  ;;  %v2384_v24 = vsel %vm860_vm3, 1.0, %v3669_v6  ;;  %v2388_v25 = vpack.i.bf16 %v2371_v14, %v2365_v12  ;;  %vm861_vm5 = vcmp.eq.f32.partialorder %v55_v0, %v2160_v4  ;;  %vm90_vm6 = vcmp.eq.f32.partialorder %v56_v15, %v2157_v3  ;;  %v61_v0 = vld [vmem:[#allocation6 + $0xc0] sm:$0xff] }
  0x3e   :  { %1793 = vrot.lane.b32.xlu0 %v2255_v36, %s2115_s1  ;;  %1798 = vrot.lane.b32.xlu1 %v2230_v28, %s2116_s6  ;;  %3760 = vst [vmem:[#allocation29_spill] sm:$0xff] %v2384_v24  ;;  %v2391_v28 = vsel %vm89_vm4, 1.0, %v3669_v6  ;;  %v2397_v31 = vsel %vm861_vm5, 1.0, %v3669_v6  ;;  %vm862_vm7 = vcmp.eq.f32.partialorder %v56_v15, %v2160_v4  ;;  %vm91_vm8 = vcmp.eq.f32.partialorder %v57_v19, %v2157_v3 }
  0x3f   :  { %3761 = vst [vmem:[#allocation30_spill] sm:$0xff] %v2391_v28  ;;  %3762 = vst [vmem:[#allocation31_spill] sm:$0xff] %v2397_v31  ;;  %v2406_v40 = vpack.i.bf16 %v2384_v24, %v2381_v21  ;;  %v2409_v47 = vsel %vm90_vm6, 1.0, %v3669_v6  ;;  %v2412_v48 = vsel %vm862_vm7, 1.0, %v3669_v6  ;;  %v2416_v55 = vpack.i.bf16 %v2397_v31, %v2391_v28 }
  0x40   :  { %3763 = vst [vmem:[#allocation32_spill] sm:$0xff] %v2409_v47  ;;  %3764 = vst [vmem:[#allocation33_spill] sm:$0xff] %v2412_v48  ;;  %v2419_v56 = vsel %vm91_vm8, 1.0, %v3669_v6  ;;  %vm863_vm9 = vcmp.eq.f32.partialorder %v57_v19, %v2160_v4  ;;  %vm92_vm10 = vcmp.eq.f32.partialorder %v58_v32, %v2157_v3  ;;  %vm864_vm11 = vcmp.eq.f32.partialorder %v58_v32, %v2160_v4 }
  0x41   :  { %3765 = vst [vmem:[#allocation34_spill] sm:$0xff] %v2419_v56  ;;  %vm93_vm12 = vcmp.eq.f32.partialorder %v59_v39, %v2157_v3  ;;  %v2432_v15 = vpack.i.bf16 %v2412_v48, %v2409_v47  ;;  %v2435_v19 = vsel %vm92_vm10, 1.0, %v3669_v6  ;;  %v2438_v31 = vsel %vm864_vm11, 1.0, %v3669_v6  ;;  %v62_v47 = vld [vmem:[#allocation6 + $0xc8] sm:$0xff] }
  0x42   :  { %1803 = vrot.lane.b32.xlu0 %v2270_v41, %s2115_s1  ;;  %1808 = vrot.lane.b32.xlu1 %v2244_v33, %s2116_s6  ;;  %v2423_v33 = vsel %vm863_vm9, 1.0, %v3669_v6  ;;  %3767 = vst [vmem:[#allocation36_spill] sm:$0xff] %v2435_v19  ;;  %3768 = vst [vmem:[#allocation37_spill] sm:$0xff] %v2438_v31  ;;  %v2447_v28 = vsel %vm93_vm12, 1.0, %v3669_v6  ;;  %vm865_vm13 = vcmp.eq.f32.partialorder %v59_v39, %v2160_v4  ;;  %vm197_vm5 = vcmask 1040384  }
  0x43   :  { %3766 = vst [vmem:[#allocation35_spill] sm:$0xff] %v2423_v33  ;;  %v2444_v32 = vpack.i.bf16 %v2423_v33, %v2419_v56  ;;  %3769 = vst [vmem:[#allocation38_spill] sm:$0xff] %v2447_v28  ;;  %v2451_v48 = vsel %vm865_vm13, 1.0, %v3669_v6  ;;  %vm94_vm14 = vcmp.eq.f32.partialorder %v60_v63, %v2157_v3  ;;  %vm866_vm15 = vcmp.eq.f32.partialorder %v60_v63, %v2160_v4 }
  0x44   :  { %3770 = vst [vmem:[#allocation39_spill] sm:$0xff] %v2451_v48  ;;  %vm95_vm0 = vcmp.eq.f32.partialorder %v61_v0, %v2157_v3  ;;  %v2458_v33 = vpack.i.bf16 %v2438_v31, %v2435_v19  ;;  %v2461_v56 = vsel %vm94_vm14, 1.0, %v3669_v6  ;;  %v2464_v39 = vsel %vm866_vm15, 1.0, %v3669_v6  ;;  %v64_v19 = vld [vmem:[#allocation6 + $0xd8] sm:$0xff] }
  0x45   :  { %3771 = vst [vmem:[#allocation40_spill] sm:$0xff] %v2461_v56  ;;  %3772 = vst [vmem:[#allocation41_spill] sm:$0xff] %v2464_v39  ;;  %v2470_v63 = vpack.i.bf16 %v2451_v48, %v2447_v28  ;;  %v2473_v24 = vsel %vm95_vm0, 1.0, %v3669_v6  ;;  %vm867_vm1 = vcmp.eq.f32.partialorder %v61_v0, %v2160_v4  ;;  %vm96_vm2 = vcmp.eq.f32.partialorder %v62_v47, %v2157_v3  ;;  %v65_v48 = vld [vmem:[#allocation6 + $0xe0] sm:$0xff] }
  0x46   :  { %1813 = vrot.lane.b32.xlu0 %v2280_v44, %s2115_s1  ;;  %1818 = vrot.lane.b32.xlu1 %v2255_v36, %s2116_s6  ;;  %v63_v36 = vld [vmem:[#allocation6 + $0xd0] sm:$0xff]  ;;  %3773 = vst [vmem:[#allocation42_spill] sm:$0xff] %v2473_v24  ;;  %v2479_v31 = vsel %vm867_vm1, 1.0, %v3669_v6  ;;  %vm868_vm3 = vcmp.eq.f32.partialorder %v62_v47, %v2160_v4  ;;  %v2486_v28 = vpack.i.bf16 %v2464_v39, %v2461_v56  ;;  %v2489_v0 = vsel %vm96_vm2, 1.0, %v3669_v6  ;;  %v66_v56 = vld [vmem:[#allocation6 + $0xe8] sm:$0xff] }
  0x47   :  { %3774 = vst [vmem:[#allocation43_spill] sm:$0xff] %v2479_v31  ;;  %vm97_vm4 = vcmp.eq.f32.partialorder %v63_v36, %v2157_v3  ;;  %3776 = vst [vmem:[#allocation45_spill] sm:$0xff] %v2489_v0  ;;  %v2496_v21 = vpack.i.bf16 %v2479_v31, %v2473_v24  ;;  %vm869_vm6 = vcmp.eq.f32.partialorder %v63_v36, %v2160_v4  ;;  %vm680_vm13 = vcmask 1046528  }
  0x48   :  { %3775 = vst [vmem:[#allocation44_spill] sm:$0xff] %v2486_v28  ;;  %v2499_v47 = vsel %vm97_vm4, 1.0, %v3669_v6  ;;  %v2505_v39 = vsel %vm869_vm6, 1.0, %v3669_v6  ;;  %vm98_vm7 = vcmp.eq.f32.partialorder %v64_v19, %v2157_v3  ;;  %vm870_vm8 = vcmp.eq.f32.partialorder %v64_v19, %v2160_v4 }
  0x49   :  { %3778 = vst [vmem:[#allocation47_spill] sm:$0xff] %v2496_v21  ;;  %3779 = vst [vmem:[#allocation48_spill] sm:$0xff] %v2499_v47  ;;  %vm99_vm9 = vcmp.eq.f32.partialorder %v65_v48, %v2157_v3  ;;  %v2517_v36 = vsel %vm98_vm7, 1.0, %v3669_v6  ;;  %v2520_v24 = vsel %vm870_vm8, 1.0, %v3669_v6  ;;  %v2524_v21 = vpack.i.bf16 %v2505_v39, %v2499_v47 }
  0x4a   :  { %1823 = vrot.lane.b32.xlu0 %v2298_v49, %s2115_s1  ;;  %1828 = vrot.lane.b32.xlu1 %v2270_v41, %s2116_s6  ;;  %v2492_v41 = vsel %vm868_vm3, 1.0, %v3669_v6  ;;  %3780 = vst [vmem:[#allocation49_spill] sm:$0xff] %v2505_v39  ;;  %3782 = vst [vmem:[#allocation51_spill] sm:$0xff] %v2517_v36  ;;  %v2527_v19 = vsel %vm99_vm9, 1.0, %v3669_v6  ;;  %vm871_vm10 = vcmp.eq.f32.partialorder %v65_v48, %v2160_v4  ;;  %v202_v28 = vrot.slane %v2192_v16, 7 }
  0x4b   :  { %3777 = vst [vmem:[#allocation46_spill] sm:$0xff] %v2492_v41  ;;  %v2514_v31 = vpack.i.bf16 %v2492_v41, %v2489_v0  ;;  %3783 = vst [vmem:[#allocation52_spill] sm:$0xff] %v2520_v24  ;;  %vm100_vm11 = vcmp.eq.f32.partialorder %v66_v56, %v2157_v3  ;;  %vm872_vm12 = vcmp.eq.f32.partialorder %v66_v56, %v2160_v4  ;;  %v972_v41 = vrot.slane %v2175_v10, 7  ;;  %v67_v0 = vld [vmem:[#allocation6 + $0xf0] sm:$0xff] }
  0x4c   :  { %3784 = vst [vmem:[#allocation53_spill] sm:$0xff] %v2524_v21  ;;  %3785 = vst [vmem:[#allocation54_spill] sm:$0xff] %v2527_v19  ;;  %v2540_v39 = vpack.i.bf16 %v2520_v24, %v2517_v36  ;;  %v2543_v47 = vsel %vm100_vm11, 1.0, %v3669_v6  ;;  %v2546_v48 = vsel %vm872_vm12, 1.0, %v3669_v6  ;;  %v135_v21 = vmax.f32 %v2169_v8, 0.0 }
  0x4d   :  { %3781 = vst [vmem:[#allocation50_spill] sm:$0xff] %v2514_v31  ;;  %3788 = vst [vmem:[#allocation57_spill] sm:$0xff] %v2543_v47  ;;  %v201_v31 = vrot.slane %v2165_v7, 7  ;;  %v907_v24 = vmax.f32 %v2188_v13, 0.0  ;;  %v1050_v36 = vsel %vm197_vm5, 0.0, %v972_v41  ;;  %vm101_vm14 = vcmp.eq.f32.partialorder %v67_v0, %v2157_v3 }
  0x4e   :  { %1833 = vrot.lane.b32.xlu0 %v2308_v52, %s2115_s1  ;;  %1838 = vrot.lane.b32.xlu1 %v2280_v44, %s2116_s6  ;;  %v2531_v44 = vsel %vm871_vm10, 1.0, %v3669_v6  ;;  %3787 = vst [vmem:[#allocation56_spill] sm:$0xff] %v2540_v39  ;;  %3789 = vst [vmem:[#allocation58_spill] sm:$0xff] %v2546_v48  ;;  %v199_v39 = vrot.slane %v2172_v9, 7  ;;  %v198_v6 = vrot.slane %v2169_v8, 7  ;;  %vm873_vm15 = vcmp.eq.f32.partialorder %v67_v0, %v2160_v4 }
  0x4f   :  { %3786 = vst [vmem:[#allocation55_spill] sm:$0xff] %v2531_v44  ;;  %v2552_v56 = vpack.i.bf16 %v2531_v44, %v2527_v19  ;;  %v279_v44 = vsel %vm197_vm5, 0.0, %v201_v31  ;;  %v3792_v19 = vmov 0.0   ;;  %v908_v2 = vmax.f32 %v2198_v18, 0.0 }
  0x50   :  { %v2573_v14 = vsel %vm197_vm5, %v198_v6, %v199_v39  ;;  %v2576_v12 = vsel %vm197_vm5, 0.0, %v198_v6  ;;  %v2579_v5 = vsel %vm873_vm15, 1.0, %v3792_v19  ;;  %v973_v39 = vrot.slane %v2195_v17, 7 }
  0x51   :  { %3790 = vst [vmem:[#allocation59_spill] sm:$0xff] %v2552_v56  ;;  %v2567_v56 = vsel %vm101_vm14, 1.0, %v3792_v19  ;;  %3794 = vst [vmem:[#allocation62_spill] sm:$0xff] %v2579_v5  ;;  %v136_v6 = vmax.f32 %v2172_v9, 0.0  ;;  %v1449_v0 = vrot.slane %v2188_v13, 1  ;;  %vm422_vm2 = vcmask 7168  }
  0x52   :  { %1843 = vrot.lane.b32.xlu0 %v2324_v57, %s2115_s1  ;;  %1848 = vrot.lane.b32.xlu1 %v2298_v49, %s2116_s6  ;;  %v2563_v49 = vpack.i.bf16 %v2546_v48, %v2543_v47  ;;  %3793 = vst [vmem:[#allocation61_spill] sm:$0xff] %v2567_v56  ;;  %v68_v48 = vld [vmem:[#allocation6 + $0xf8] sm:$0xff]  ;;  %v2583_v47 = vmax.f32 %v135_v21, %v279_v44  ;;  %v970_v21 = vrot.slane %v2198_v18, 7  ;;  %v2605_v44 = vsel %vm197_vm5, 0.0, %v969_v62 }
  0x53   :  { %vm102_vm0 = vcmp.eq.f32.partialorder %v68_v48, %v2157_v3  ;;  %vm874_vm1 = vcmp.eq.f32.partialorder %v68_v48, %v2160_v4  ;;  %vm615_vm3 = vcmask 121856   ;;  %vm1641_vm4 = vcmask 130048  }
  0x54   :  { %3791 = vst [vmem:[#allocation60_spill] sm:$0xff] %v2563_v49  ;;  %v2585_v49 = vmax.f32 %v907_v24, %v1050_v36  ;;  %v2601_v24 = vpack.i.bf16 %v2579_v5, %v2567_v56  ;;  %v974_v36 = vsel %vm197_vm5, %v972_v41, %v973_v39  ;;  %v2608_v61 = vsel %vm102_vm0, 1.0, %v3792_v19 }
  0x55   :  { %3795 = vst [vmem:[#allocation63_spill] sm:$0xff] %v2608_v61  ;;  %v2615_v3 = vsel %vm197_vm5, %v969_v62, %v970_v21  ;;  %v2621_v41 = vsel %vm874_vm1, 1.0, %v3792_v19  ;;  %v1450_v39 = vrot.slane %v2198_v18, 1  ;;  %v681_v62 = vrot.slane %v2169_v8, 1 }
  0x56   :  { %1853 = vrot.lane.b32.xlu0 %v2336_v60, %s2115_s1  ;;  %1858 = vrot.lane.b32.xlu1 %v2308_v52, %s2116_s6  ;;  %v203_v52 = vsel %vm197_vm5, %v201_v31, %v202_v28  ;;  %v2618_v31 = vmax.f32 %v908_v2, %v974_v36  ;;  %3796 = vst [vmem:[#allocation64_spill] sm:$0xff] %v2621_v41  ;;  %v685_v21 = vrot.slane %v2192_v16, 1  ;;  %v1452_v36 = vrot.slane %v2175_v10, 1 }
  0x57   :  { %v2612_v28 = vmax.f32 %v136_v6, %v203_v52  ;;  %v682_v6 = vrot.slane %v2172_v9, 1  ;;  %v2633_v4 = vpack.i.bf16 %v2621_v41, %v2608_v61  ;;  %v2636_v2 = vsel %vm680_vm13, %v1450_v39, 0.0 }
  0x58   :  { %3797 = vst [vmem:[#allocation65_spill] sm:$0xff] %v2636_v2  ;;  %v2639_v19 = vsel %vm680_vm13, %v1449_v0, %v1450_v39  ;;  %v684_v52 = vrot.slane %v2165_v7, 1  ;;  %v1453_v5 = vrot.slane %v2195_v17, 1  ;;  %v204_v41 = vrot.slane %v2212_v22, 7 }
  0x59   :  { %3798 = vst [vmem:[#allocation66_spill] sm:$0xff] %v2639_v19  ;;  %v2644_v48 = vsel %vm680_vm13, %v682_v6, 0.0  ;;  %v2653_v0 = vsel %vm680_vm13, %v681_v62, %v682_v6  ;;  %v909_v39 = vmax.f32 %v2175_v10, 0.0  ;;  %v975_v61 = vrot.slane %v2215_v23, 7 }
  0x5a   :  { %1863 = vrot.lane.b32.xlu0 %v2350_v1, %s2115_s1  ;;  %1868 = vrot.lane.b32.xlu1 %v2324_v57, %s2116_s6  ;;  %3799 = vst [vmem:[#allocation67_spill] sm:$0xff] %v2644_v48  ;;  %v137_v57 = vmax.f32 %v2165_v7, 0.0  ;;  %3800 = vst [vmem:[#allocation68_spill] sm:$0xff] %v2653_v0  ;;  %v2663_v56 = vsel %vm680_vm13, %v1452_v36, %v1453_v5  ;;  %v280_v2 = vsel %vm197_vm5, 0.0, %v204_v41  ;;  %v2667_v19 = vsel %vm680_vm13, %v685_v21, 0.0 }
  0x5b   :  { %3802 = vst [vmem:[#allocation70_spill] sm:$0xff] %v2663_v56  ;;  %3803 = vst [vmem:[#allocation71_spill] sm:$0xff] %v2667_v19  ;;  %v138_v6 = vmax.f32 %v2192_v16, 0.0  ;;  %v1051_v62 = vsel %vm197_vm5, 0.0, %v975_v61  ;;  %v910_v36 = vmax.f32 %v2195_v17, 0.0  ;;  %v976_v48 = vrot.slane %v2223_v27, 7 }
  0x5c   :  { %v2678_v56 = vmax.f32 %v137_v57, %v280_v2  ;;  %v688_v19 = vrot.slane %v2220_v26, 1  ;;  %v2683_v0 = vmax.f32 %v909_v39, %v1051_v62  ;;  %v1455_v16 = vrot.slane %v2215_v23, 1 }
  0x5d   :  { %v977_v57 = vsel %vm197_vm5, %v975_v61, %v976_v48  ;;  %v139_v2 = vmax.f32 %v2212_v22, 0.0  ;;  %v978_v62 = vrot.slane %v2237_v30, 7 }
  0x5e   :  { %1873 = vrot.lane.b32.xlu0 %v2362_v11, %s2115_s1  ;;  %1878 = vrot.lane.b32.xlu1 %v2336_v60, %s2116_s6  ;;  %v2656_v60 = vsel %vm680_vm13, %v684_v52, %v685_v21  ;;  %v2674_v52 = vsel %vm680_vm13, %v1453_v5, 0.0  ;;  %3805 = vst [vmem:[#allocation73_spill] sm:$0xff] %v2678_v56  ;;  %v687_v21 = vrot.slane %v2212_v22, 1  ;;  %v1456_v5 = vrot.slane %v2223_v27, 1 }
  0x5f   :  { %3801 = vst [vmem:[#allocation69_spill] sm:$0xff] %v2656_v60  ;;  %3804 = vst [vmem:[#allocation72_spill] sm:$0xff] %v2674_v52  ;;  %v205_v60 = vrot.slane %v2220_v26, 7  ;;  %v207_v56 = vrot.slane %v2233_v29, 7  ;;  %v2697_v39 = vmax.f32 %v910_v36, %v977_v57  ;;  %v2709_v48 = vsel %vm680_vm13, %v688_v19, 0.0 }
  0x60   :  { %3809 = vst [vmem:[#allocation77_spill] sm:$0xff] %v2709_v48  ;;  %v2714_v36 = vsel %vm680_vm13, %v1456_v5, 0.0  ;;  %v912_v57 = vmax.f32 %v2223_v27, 0.0  ;;  %v691_v48 = vrot.slane %v2247_v34, 1 }
  0x61   :  { %v281_v61 = vsel %vm197_vm5, 0.0, %v207_v56  ;;  %3810 = vst [vmem:[#allocation78_spill] sm:$0xff] %v2714_v36 }
  0x62   :  { %1883 = vrot.lane.b32.xlu0 %v2378_v20, %s2115_s1  ;;  %1888 = vrot.lane.b32.xlu1 %v2350_v1, %s2116_s6  ;;  %v206_v1 = vsel %vm197_vm5, %v204_v41, %v205_v60  ;;  %v2700_v41 = vsel %vm680_vm13, %v687_v21, %v688_v19  ;;  %v911_v60 = vmax.f32 %v2215_v23, 0.0  ;;  %v208_v21 = vrot.slane %v2247_v34, 7 }
  0x63   :  { %v2690_v52 = vmax.f32 %v138_v6, %v206_v1  ;;  %3807 = vst [vmem:[#allocation75_spill] sm:$0xff] %v2700_v41  ;;  %v2705_v6 = vsel %vm680_vm13, %v1455_v16, %v1456_v5  ;;  %v140_v1 = vmax.f32 %v2220_v26, 0.0  ;;  %v2720_v16 = vmax.f32 %v139_v2, %v281_v61 }
  0x64   :  { %3808 = vst [vmem:[#allocation76_spill] sm:$0xff] %v2705_v6  ;;  %v979_v6 = vrot.slane %v2250_v35, 7  ;;  %v690_v19 = vrot.slane %v2233_v29, 1  ;;  %v209_v36 = vsel %vm197_vm5, %v207_v56, %v208_v21  ;;  %v1458_v41 = vrot.slane %v2237_v30, 1 }
  0x65   :  { %3806 = vst [vmem:[#allocation74_spill] sm:$0xff] %v2690_v52  ;;  %3811 = vst [vmem:[#allocation79_spill] sm:$0xff] %v2720_v16  ;;  %v1459_v52 = vrot.slane %v2250_v35, 1  ;;  %v2732_v26 = vmax.f32 %v140_v1, %v209_v36  ;;  %v141_v61 = vmax.f32 %v2233_v29, 0.0  ;;  %v210_v16 = vrot.slane %v2258_v37, 7 }
  0x66   :  { %1893 = vrot.lane.b32.xlu0 %v2388_v25, %s2115_s1  ;;  %1898 = vrot.lane.b32.xlu1 %v2362_v11, %s2116_s6  ;;  %v1052_v11 = vsel %vm197_vm5, 0.0, %v978_v62  ;;  %v980_v2 = vsel %vm197_vm5, %v978_v62, %v979_v6  ;;  %v981_v56 = vrot.slane %v2263_v38, 7  ;;  %v2751_v6 = vsel %vm680_vm13, %v691_v48, 0.0 }
  0x67   :  { %v2727_v5 = vmax.f32 %v911_v60, %v1052_v11  ;;  %v2737_v27 = vmax.f32 %v912_v57, %v980_v2  ;;  %v913_v60 = vmax.f32 %v2237_v30, 0.0  ;;  %v2747_v1 = vsel %vm680_vm13, %v1458_v41, %v1459_v52  ;;  %3814 = vst [vmem:[#allocation82_spill] sm:$0xff] %v2751_v6 }
  0x68   :  { %3813 = vst [vmem:[#allocation81_spill] sm:$0xff] %v2747_v1  ;;  %v282_v62 = vsel %vm197_vm5, 0.0, %v210_v16  ;;  %v142_v11 = vmax.f32 %v2247_v34, 0.0  ;;  %v1053_v36 = vsel %vm197_vm5, 0.0, %v981_v56  ;;  %v2758_v21 = vsel %vm680_vm13, %v1459_v52, 0.0 }
  0x69   :  { %3815 = vst [vmem:[#allocation83_spill] sm:$0xff] %v2758_v21  ;;  %v211_v57 = vrot.slane %v2273_v42, 7  ;;  %v914_v41 = vmax.f32 %v2250_v35, 0.0  ;;  %v982_v2 = vrot.slane %v2276_v43, 7  ;;  %v694_v6 = vrot.slane %v2273_v42, 1 }
  0x6a   :  { %1903 = vrot.lane.b32.xlu0 %v2406_v40, %s2115_s1  ;;  %1908 = vrot.lane.b32.xlu1 %v2378_v20, %s2116_s6  ;;  %v2740_v20 = vsel %vm680_vm13, %v690_v19, %v691_v48  ;;  %v2762_v19 = vmax.f32 %v141_v61, %v282_v62  ;;  %v693_v48 = vrot.slane %v2258_v37, 1  ;;  %v2767_v1 = vmax.f32 %v913_v60, %v1053_v36 }
  0x6b   :  { %3812 = vst [vmem:[#allocation80_spill] sm:$0xff] %v2740_v20  ;;  %v1461_v20 = vrot.slane %v2263_v38, 1  ;;  %v1462_v52 = vrot.slane %v2276_v43, 1  ;;  %v983_v61 = vsel %vm197_vm5, %v981_v56, %v982_v2  ;;  %v143_v62 = vmax.f32 %v2258_v37, 0.0 }
  0x6c   :  { %3816 = vst [vmem:[#allocation84_spill] sm:$0xff] %v2762_v19  ;;  %v213_v19 = vrot.slane %v2283_v45, 7  ;;  %v2781_v60 = vmax.f32 %v914_v41, %v983_v61  ;;  %v915_v36 = vmax.f32 %v2263_v38, 0.0  ;;  %v2793_v2 = vsel %vm680_vm13, %v694_v6, 0.0 }
  0x6d   :  { %3820 = vst [vmem:[#allocation88_spill] sm:$0xff] %v2793_v2  ;;  %v2798_v41 = vsel %vm680_vm13, %v1462_v52, 0.0  ;;  %v916_v61 = vmax.f32 %v2276_v43, 0.0  ;;  %v697_v2 = vrot.slane %v2301_v50, 1 }
  0x6e   :  { %1913 = vrot.lane.b32.xlu0 %v2416_v55, %s2115_s1  ;;  %1918 = vrot.lane.b32.xlu1 %v2388_v25, %s2116_s6  ;;  %v212_v25 = vsel %vm197_vm5, %v210_v16, %v211_v57  ;;  %3817 = vst [vmem:[#allocation85_spill] sm:$0xff] %v2781_v60  ;;  %v2784_v16 = vsel %vm680_vm13, %v693_v48, %v694_v6  ;;  %v984_v57 = vrot.slane %v2289_v46, 7  ;;  %v283_v56 = vsel %vm197_vm5, 0.0, %v213_v19 }
  0x6f   :  { %v2774_v21 = vmax.f32 %v142_v11, %v212_v25  ;;  %3818 = vst [vmem:[#allocation86_spill] sm:$0xff] %v2784_v16  ;;  %v2789_v11 = vsel %vm680_vm13, %v1461_v20, %v1462_v52  ;;  %v144_v25 = vmax.f32 %v2273_v42, 0.0  ;;  %3821 = vst [vmem:[#allocation89_spill] sm:$0xff] %v2798_v41  ;;  %v214_v48 = vrot.slane %v2301_v50, 7 }
  0x70   :  { %3819 = vst [vmem:[#allocation87_spill] sm:$0xff] %v2789_v11  ;;  %v2804_v20 = vmax.f32 %v143_v62, %v283_v56  ;;  %v985_v11 = vrot.slane %v2304_v51, 7  ;;  %v696_v6 = vrot.slane %v2283_v45, 1  ;;  %v1464_v16 = vrot.slane %v2289_v46, 1 }
  0x71   :  { %v215_v41 = vsel %vm197_vm5, %v213_v19, %v214_v48  ;;  %v1465_v60 = vrot.slane %v2304_v51, 1  ;;  %v145_v56 = vmax.f32 %v2283_v45, 0.0  ;;  %v987_v19 = vrot.slane %v2315_v54, 7 }
  0x72   :  { %1923 = vrot.lane.b32.xlu0 %v2432_v15, %s2115_s1  ;;  %1928 = vrot.lane.b32.xlu1 %v2406_v40, %s2116_s6  ;;  %v1054_v40 = vsel %vm197_vm5, 0.0, %v984_v57  ;;  %3822 = vst [vmem:[#allocation90_spill] sm:$0xff] %v2804_v20  ;;  %v2816_v43 = vmax.f32 %v144_v25, %v215_v41  ;;  %v986_v62 = vsel %vm197_vm5, %v984_v57, %v985_v11  ;;  %v216_v20 = vrot.slane %v2311_v53, 7 }
  0x73   :  { %v2811_v52 = vmax.f32 %v915_v36, %v1054_v40  ;;  %v2821_v42 = vmax.f32 %v916_v61, %v986_v62  ;;  %v917_v36 = vmax.f32 %v2289_v46, 0.0  ;;  %v2831_v25 = vsel %vm680_vm13, %v1464_v16, %v1465_v60 }
  0x74   :  { %3823 = vst [vmem:[#allocation91_spill] sm:$0xff] %v2816_v43  ;;  %3826 = vst [vmem:[#allocation94_spill] sm:$0xff] %v2831_v25  ;;  %v284_v57 = vsel %vm197_vm5, 0.0, %v216_v20  ;;  %v2835_v11 = vsel %vm680_vm13, %v697_v2, 0.0  ;;  %v146_v40 = vmax.f32 %v2301_v50, 0.0  ;;  %v1055_v41 = vsel %vm197_vm5, 0.0, %v987_v19 }
  0x75   :  { %3824 = vst [vmem:[#allocation92_spill] sm:$0xff] %v2821_v42  ;;  %3827 = vst [vmem:[#allocation95_spill] sm:$0xff] %v2835_v11  ;;  %v2842_v48 = vsel %vm680_vm13, %v1465_v60, 0.0  ;;  %v217_v61 = vrot.slane %v2327_v58, 7  ;;  %v918_v16 = vmax.f32 %v2304_v51, 0.0  ;;  %v988_v62 = vrot.slane %v2330_v59, 7 }
  0x76   :  { %1933 = vrot.lane.b32.xlu0 %v2444_v32, %s2115_s1  ;;  %1938 = vrot.lane.b32.xlu1 %v2416_v55, %s2116_s6  ;;  %v2824_v55 = vsel %vm680_vm13, %v696_v6, %v697_v2  ;;  %3828 = vst [vmem:[#allocation96_spill] sm:$0xff] %v2842_v48  ;;  %v2846_v6 = vmax.f32 %v145_v56, %v284_v57  ;;  %v699_v2 = vrot.slane %v2311_v53, 1  ;;  %v700_v11 = vrot.slane %v2327_v58, 1 }
  0x77   :  { %3825 = vst [vmem:[#allocation93_spill] sm:$0xff] %v2824_v55  ;;  %v2851_v25 = vmax.f32 %v917_v36, %v1055_v41  ;;  %v1467_v55 = vrot.slane %v2315_v54, 1  ;;  %v1468_v60 = vrot.slane %v2330_v59, 1  ;;  %v989_v56 = vsel %vm197_vm5, %v987_v19, %v988_v62 }
  0x78   :  { %3829 = vst [vmem:[#allocation97_spill] sm:$0xff] %v2846_v6  ;;  %v147_v57 = vmax.f32 %v2311_v53, 0.0  ;;  %v3832_v6 = vld [vmem:[#allocation22_spill] sm:$0xff]  ;;  %v2865_v36 = vmax.f32 %v918_v16, %v989_v56  ;;  %v919_v41 = vmax.f32 %v2315_v54, 0.0  ;;  %v2877_v62 = vsel %vm680_vm13, %v700_v11, 0.0 }
  0x79   :  { %3830 = vst [vmem:[#allocation98_spill] sm:$0xff] %v2851_v25  ;;  %v219_v42 = vrot.slane %v3832_v6, 7  ;;  %3837 = vst [vmem:[#allocation103_spill] sm:$0xff] %v2877_v62  ;;  %v2882_v16 = vsel %vm680_vm13, %v1468_v60, 0.0 }
  0x7a   :  { %1943 = vrot.lane.b32.xlu0 %v2458_v33, %s2115_s1  ;;  %1948 = vrot.lane.b32.xlu1 %v2432_v15, %s2116_s6  ;;  %v218_v15 = vsel %vm197_vm5, %v216_v20, %v217_v61  ;;  %3833 = vst [vmem:[#allocation100_spill] sm:$0xff] %v2865_v36  ;;  %v2868_v20 = vsel %vm680_vm13, %v699_v2, %v700_v11  ;;  %v3835_v61 = vld [vmem:[#allocation23_spill] sm:$0xff]  ;;  %3838 = vst [vmem:[#allocation104_spill] sm:$0xff] %v2882_v16  ;;  %v3839_v2 = vld [vmem:[#allocation24_spill] sm:$0xff]  ;;  %v702_v11 = vrot.slane %v3832_v6, 1 }
  0x7b   :  { %v2858_v48 = vmax.f32 %v146_v40, %v218_v15  ;;  %3834 = vst [vmem:[#allocation101_spill] sm:$0xff] %v2868_v20  ;;  %v990_v25 = vrot.slane %v3835_v61, 7  ;;  %v2873_v40 = vsel %vm680_vm13, %v1467_v55, %v1468_v60  ;;  %v285_v19 = vsel %vm197_vm5, 0.0, %v219_v42 }
  0x7c   :  { %3836 = vst [vmem:[#allocation102_spill] sm:$0xff] %v2873_v40  ;;  %v148_v15 = vmax.f32 %v2327_v58, 0.0  ;;  %v220_v56 = vrot.slane %v3839_v2, 7  ;;  %v920_v20 = vmax.f32 %v2330_v59, 0.0  ;;  %v2888_v55 = vmax.f32 %v147_v57, %v285_v19  ;;  %v3842_v40 = vld [vmem:[#allocation25_spill] sm:$0xff] }
  0x7d   :  { %3831 = vst [vmem:[#allocation99_spill] sm:$0xff] %v2858_v48  ;;  %v3840_v48 = vld [vmem:[#allocation44_spill] sm:$0xff]  ;;  %v991_v36 = vrot.slane %v3842_v40, 7  ;;  %v703_v62 = vrot.slane %v3839_v2, 1  ;;  %v1470_v59 = vrot.slane %v3835_v61, 1  ;;  %v1471_v58 = vrot.slane %v3842_v40, 1 }
  0x7e   :  { %1953 = vrot.lane.b32.xlu0 %v2470_v63, %s2115_s1  ;;  %1958 = vrot.lane.b32.xlu1 %v2444_v32, %s2116_s6  ;;  %v1056_v32 = vsel %vm197_vm5, 0.0, %v990_v25  ;;  %3841 = vst [vmem:[#allocation44_spill] sm:$0xff] %v2888_v55  ;;  %v221_v16 = vsel %vm197_vm5, %v219_v42, %v220_v56  ;;  %v149_v19 = vmax.f32 %v3832_v6, 0.0  ;;  %v3845_v55 = vld [vmem:[#allocation26_spill] sm:$0xff]  ;;  %v3848_v42 = vld [vmem:[#allocation27_spill] sm:$0xff] }
  0x7f   :  { %v2895_v60 = vmax.f32 %v919_v41, %v1056_v32  ;;  %v2900_v54 = vmax.f32 %v148_v15, %v221_v16  ;;  %v992_v57 = vsel %vm197_vm5, %v990_v25, %v991_v36  ;;  %v222_v53 = vrot.slane %v3845_v55, 7  ;;  %v3849_v56 = vld [vmem:[#allocation47_spill] sm:$0xff] }
  0x80   :  { %v2905_v51 = vmax.f32 %v920_v20, %v992_v57  ;;  %v921_v41 = vmax.f32 %v3835_v61, 0.0  ;;  %v993_v32 = vrot.slane %v3848_v42, 7  ;;  %v2915_v15 = vsel %vm680_vm13, %v1470_v59, %v1471_v58  ;;  %v3853_v57 = vld [vmem:[#allocation28_spill] sm:$0xff] }
  0x81   :  { %3843 = vst [vmem:[#allocation105_spill] sm:$0xff] %v2895_v60  ;;  %3844 = vst [vmem:[#allocation106_spill] sm:$0xff] %v2900_v54  ;;  %v286_v25 = vsel %vm197_vm5, 0.0, %v222_v53  ;;  %v2919_v36 = vsel %vm680_vm13, %v703_v62, 0.0  ;;  %v150_v20 = vmax.f32 %v3839_v2, 0.0  ;;  %v922_v59 = vmax.f32 %v3842_v40, 0.0 }
  0x82   :  { %1963 = vrot.lane.b32.xlu0 %v3840_v48, %s2115_s1  ;;  %1968 = vrot.lane.b32.xlu1 %v2458_v33, %s2116_s6  ;;  %3846 = vst [vmem:[#allocation107_spill] sm:$0xff] %v2905_v51  ;;  %v2908_v33 = vsel %vm680_vm13, %v702_v11, %v703_v62  ;;  %3850 = vst [vmem:[#allocation47_spill] sm:$0xff] %v2915_v15  ;;  %v1057_v16 = vsel %vm197_vm5, 0.0, %v993_v32  ;;  %v2926_v11 = vsel %vm680_vm13, %v1471_v58, 0.0  ;;  %v3855_v51 = vld [vmem:[#allocation29_spill] sm:$0xff]  ;;  %v705_v62 = vrot.slane %v3845_v55, 1 }
  0x83   :  { %3847 = vst [vmem:[#allocation108_spill] sm:$0xff] %v2908_v33  ;;  %3851 = vst [vmem:[#allocation109_spill] sm:$0xff] %v2919_v36  ;;  %v223_v33 = vrot.slane %v3853_v57, 7  ;;  %v2930_v15 = vmax.f32 %v149_v19, %v286_v25  ;;  %v994_v54 = vrot.slane %v3855_v51, 7  ;;  %v706_v36 = vrot.slane %v3853_v57, 1 }
  0x84   :  { %3852 = vst [vmem:[#allocation110_spill] sm:$0xff] %v2926_v11  ;;  %v2935_v2 = vmax.f32 %v921_v41, %v1057_v16  ;;  %v1473_v60 = vrot.slane %v3848_v42, 1  ;;  %v1474_v58 = vrot.slane %v3855_v51, 1  ;;  %v3857_v11 = vld [vmem:[#allocation50_spill] sm:$0xff]  ;;  %v151_v25 = vmax.f32 %v3845_v55, 0.0  ;;  %v3862_v16 = vld [vmem:[#allocation31_spill] sm:$0xff] }
  0x85   :  { %3854 = vst [vmem:[#allocation111_spill] sm:$0xff] %v2930_v15  ;;  %v995_v19 = vsel %vm197_vm5, %v993_v32, %v994_v54  ;;  %v3859_v15 = vld [vmem:[#allocation30_spill] sm:$0xff]  ;;  %v2961_v32 = vsel %vm680_vm13, %v706_v36, 0.0 }
  0x86   :  { %1973 = vrot.lane.b32.xlu0 %v3849_v56, %s2115_s1  ;;  %1978 = vrot.lane.b32.xlu1 %v2470_v63, %s2116_s6  ;;  %3856 = vst [vmem:[#allocation112_spill] sm:$0xff] %v2935_v2  ;;  %v224_v63 = vsel %vm197_vm5, %v222_v53, %v223_v33  ;;  %v225_v61 = vrot.slane %v3859_v15, 7  ;;  %v2949_v41 = vmax.f32 %v922_v59, %v995_v19  ;;  %v923_v33 = vmax.f32 %v3848_v42, 0.0 }
  0x87   :  { %v2942_v40 = vmax.f32 %v150_v20, %v224_v63  ;;  %v2952_v53 = vsel %vm680_vm13, %v705_v62, %v706_v36  ;;  %v996_v2 = vrot.slane %v3862_v16, 7  ;;  %v2957_v20 = vsel %vm680_vm13, %v1473_v60, %v1474_v58  ;;  %3864 = vst [vmem:[#allocation116_spill] sm:$0xff] %v2961_v32  ;;  %v3866_v62 = vld [vmem:[#allocation32_spill] sm:$0xff] }
  0x88   :  { %3860 = vst [vmem:[#allocation113_spill] sm:$0xff] %v2949_v41  ;;  %3861 = vst [vmem:[#allocation114_spill] sm:$0xff] %v2952_v53  ;;  %v287_v54 = vsel %vm197_vm5, 0.0, %v225_v61  ;;  %v152_v63 = vmax.f32 %v3853_v57, 0.0  ;;  %v2966_v59 = vsel %vm680_vm13, %v1474_v58, 0.0  ;;  %v226_v19 = vrot.slane %v3866_v62, 7 }
  0x89   :  { %3858 = vst [vmem:[#allocation50_spill] sm:$0xff] %v2942_v40  ;;  %3863 = vst [vmem:[#allocation115_spill] sm:$0xff] %v2957_v20  ;;  %v924_v53 = vmax.f32 %v3855_v51, 0.0  ;;  %v3867_v40 = vld [vmem:[#allocation53_spill] sm:$0xff]  ;;  %v2972_v60 = vmax.f32 %v151_v25, %v287_v54  ;;  %v708_v36 = vrot.slane %v3859_v15, 1  ;;  %v709_v32 = vrot.slane %v3866_v62, 1 }
  0x8a   :  { %1983 = vrot.lane.b32.xlu0 %v3857_v11, %s2115_s1  ;;  %1988 = vrot.lane.b32.xlu1 %v3840_v48, %s2116_s6  ;;  %v1058_v48 = vsel %vm197_vm5, 0.0, %v996_v2  ;;  %3865 = vst [vmem:[#allocation117_spill] sm:$0xff] %v2966_v59  ;;  %v3869_v20 = vld [vmem:[#allocation33_spill] sm:$0xff]  ;;  %v227_v59 = vsel %vm197_vm5, %v225_v61, %v226_v19  ;;  %v1476_v51 = vrot.slane %v3862_v16, 1  ;;  %v153_v54 = vmax.f32 %v3859_v15, 0.0  ;;  %v3875_v61 = vld [vmem:[#allocation35_spill] sm:$0xff] }
  0x8b   :  { %3868 = vst [vmem:[#allocation53_spill] sm:$0xff] %v2972_v60  ;;  %v997_v41 = vrot.slane %v3869_v20, 7  ;;  %v2979_v58 = vmax.f32 %v923_v33, %v1058_v48  ;;  %v1477_v57 = vrot.slane %v3869_v20, 1  ;;  %v2984_v42 = vmax.f32 %v152_v63, %v227_v59  ;;  %v3872_v60 = vld [vmem:[#allocation34_spill] sm:$0xff]  ;;  %v3876_v19 = vld [vmem:[#allocation56_spill] sm:$0xff] }
  0x8c   :  { %v228_v55 = vrot.slane %v3872_v60, 7  ;;  %v925_v33 = vmax.f32 %v3862_v16, 0.0  ;;  %v999_v48 = vrot.slane %v3875_v61, 7 }
  0x8d   :  { %3870 = vst [vmem:[#allocation118_spill] sm:$0xff] %v2979_v58  ;;  %3871 = vst [vmem:[#allocation119_spill] sm:$0xff] %v2984_v42  ;;  %v998_v25 = vsel %vm197_vm5, %v996_v2, %v997_v41  ;;  %v2999_v63 = vsel %vm680_vm13, %v1476_v51, %v1477_v57  ;;  %v3003_v41 = vsel %vm680_vm13, %v709_v32, 0.0  ;;  %v926_v51 = vmax.f32 %v3869_v20, 0.0  ;;  %v3884_v58 = vld [vmem:[#allocation59_spill] sm:$0xff] }
  0x8e   :  { %1993 = vrot.lane.b32.xlu0 %v3867_v40, %s2115_s1  ;;  %1998 = vrot.lane.b32.xlu1 %v3849_v56, %s2116_s6  ;;  %v2989_v6 = vmax.f32 %v924_v53, %v998_v25  ;;  %v2992_v56 = vsel %vm680_vm13, %v708_v36, %v709_v32  ;;  %3877 = vst [vmem:[#allocation56_spill] sm:$0xff] %v2999_v63  ;;  %v288_v2 = vsel %vm197_vm5, 0.0, %v228_v55  ;;  %3878 = vst [vmem:[#allocation122_spill] sm:$0xff] %v3003_v41  ;;  %v3880_v25 = vld [vmem:[#allocation36_spill] sm:$0xff] }
  0x8f   :  { %3874 = vst [vmem:[#allocation121_spill] sm:$0xff] %v2992_v56  ;;  %v154_v53 = vmax.f32 %v3866_v62, 0.0  ;;  %v1059_v59 = vsel %vm197_vm5, 0.0, %v999_v48  ;;  %v3010_v36 = vsel %vm680_vm13, %v1477_v57, 0.0  ;;  %v229_v56 = vrot.slane %v3880_v25, 7 }
  0x90   :  { %3873 = vst [vmem:[#allocation120_spill] sm:$0xff] %v2989_v6  ;;  %3879 = vst [vmem:[#allocation123_spill] sm:$0xff] %v3010_v36  ;;  %v3014_v63 = vmax.f32 %v153_v54, %v288_v2  ;;  %v3882_v6 = vld [vmem:[#allocation37_spill] sm:$0xff]  ;;  %v711_v41 = vrot.slane %v3872_v60, 1  ;;  %v712_v62 = vrot.slane %v3880_v25, 1  ;;  %v3019_v42 = vmax.f32 %v925_v33, %v1059_v59  ;;  %v3890_v59 = vld [vmem:[#allocation39_spill] sm:$0xff] }
  0x91   :  { %v1000_v32 = vrot.slane %v3882_v6, 7  ;;  %v1479_v57 = vrot.slane %v3875_v61, 1  ;;  %v1480_v36 = vrot.slane %v3882_v6, 1  ;;  %v155_v2 = vmax.f32 %v3872_v60, 0.0 }
  0x92   :  { %2003 = vrot.lane.b32.xlu0 %v3876_v19, %s2115_s1  ;;  %2008 = vrot.lane.b32.xlu1 %v3857_v11, %s2116_s6  ;;  %3881 = vst [vmem:[#allocation124_spill] sm:$0xff] %v3014_v63  ;;  %3883 = vst [vmem:[#allocation125_spill] sm:$0xff] %v3019_v42  ;;  %v230_v11 = vsel %vm197_vm5, %v228_v55, %v229_v56  ;;  %v3886_v63 = vld [vmem:[#allocation38_spill] sm:$0xff]  ;;  %v3036_v55 = vsel %vm680_vm13, %v711_v41, %v712_v62  ;;  %v3893_v41 = vld [vmem:[#allocation40_spill] sm:$0xff] }
  0x93   :  { %v3026_v20 = vmax.f32 %v154_v53, %v230_v11  ;;  %v1001_v54 = vsel %vm197_vm5, %v999_v48, %v1000_v32  ;;  %v231_v16 = vrot.slane %v3886_v63, 7  ;;  %3888 = vst [vmem:[#allocation127_spill] sm:$0xff] %v3036_v55  ;;  %v3039_v56 = vsel %vm680_vm13, %v1479_v57, %v1480_v36 }
  0x94   :  { %v3033_v33 = vmax.f32 %v926_v51, %v1001_v54  ;;  %3889 = vst [vmem:[#allocation128_spill] sm:$0xff] %v3039_v56  ;;  %v1002_v53 = vrot.slane %v3890_v59, 7  ;;  %v927_v48 = vmax.f32 %v3875_v61, 0.0  ;;  %v3045_v32 = vsel %vm680_vm13, %v712_v62, 0.0  ;;  %v3894_v56 = vld [vmem:[#allocation60_spill] sm:$0xff] }
  0x95   :  { %3885 = vst [vmem:[#allocation59_spill] sm:$0xff] %v3026_v20  ;;  %v289_v11 = vsel %vm197_vm5, 0.0, %v231_v16  ;;  %3891 = vst [vmem:[#allocation39_spill] sm:$0xff] %v3045_v32  ;;  %v156_v20 = vmax.f32 %v3880_v25, 0.0  ;;  %v3050_v51 = vsel %vm680_vm13, %v1480_v36, 0.0  ;;  %v232_v54 = vrot.slane %v3893_v41, 7 }
  0x96   :  { %2013 = vrot.lane.b32.xlu0 %v3884_v58, %s2115_s1  ;;  %2018 = vrot.lane.b32.xlu1 %v3867_v40, %s2116_s6  ;;  %3887 = vst [vmem:[#allocation126_spill] sm:$0xff] %v3033_v33  ;;  %v1060_v40 = vsel %vm197_vm5, 0.0, %v1002_v53  ;;  %3892 = vst [vmem:[#allocation129_spill] sm:$0xff] %v3050_v51  ;;  %v928_v57 = vmax.f32 %v3882_v6, 0.0  ;;  %v3056_v55 = vmax.f32 %v155_v2, %v289_v11  ;;  %v3896_v33 = vld [vmem:[#allocation41_spill] sm:$0xff]  ;;  %v714_v62 = vrot.slane %v3886_v63, 1 }
  0x97   :  { %v1003_v42 = vrot.slane %v3896_v33, 7  ;;  %v233_v36 = vsel %vm197_vm5, %v231_v16, %v232_v54  ;;  %v1482_v51 = vrot.slane %v3890_v59, 1  ;;  %v157_v25 = vmax.f32 %v3886_v63, 0.0  ;;  %v3897_v32 = vld [vmem:[#allocation42_spill] sm:$0xff] }
  0x98   :  { %3895 = vst [vmem:[#allocation40_spill] sm:$0xff] %v3056_v55  ;;  %v3067_v2 = vmax.f32 %v927_v48, %v1060_v40  ;;  %v3069_v11 = vmax.f32 %v156_v20, %v233_v36  ;;  %v3741_v60 = vrot.slane %v3897_v32, 7  ;;  %v3898_v54 = vrot.slane %v3893_v41, 1 }
  0x99   :  { %v1004_v55 = vsel %vm197_vm5, %v1002_v53, %v1003_v42  ;;  %v3899_v20 = vrot.slane %v3896_v33, 1  ;;  %v3901_v36 = vmax.f32 %v2573_v14, 0.0 }
  0x9a   :  { %2023 = vrot.lane.b32.xlu0 %v3894_v56, %s2115_s1  ;;  %2028 = vrot.lane.b32.xlu1 %v3876_v19, %s2116_s6  ;;  %v3073_v16 = vmax.f32 %v928_v57, %v1004_v55  ;;  %v3078_v6 = vsel %vm680_vm13, %v714_v62, %v3898_v54  ;;  %v3900_v57 = vmax.f32 %v2576_v12, 0.0 }
  0x9b   :  { %v3085_v42 = vsel %vm680_vm13, %v1482_v51, %v3899_v20 }
  0x9c   :  { %v1744_v61 = vpop.permute.xlu0 %1743  ;;  %v1754_v15 = vpop.permute.xlu1 %1753 }
  0x9d   :  { %v1746_v19 = vunpack.i.h.bf16 %v1744_v61  ;;  %v1745_v50 = vunpack.i.l.bf16 %v1744_v61  ;;  %v1756_v63 = vunpack.i.h.bf16 %v1754_v15  ;;  %v1755_v43 = vunpack.i.l.bf16 %v1754_v15 }
  0x9e   :  { %2033 = vrot.lane.b32.xlu0 %v2601_v24, %s2115_s1  ;;  %v290_v61 = vsel %vm197_vm5, 0.0, %v3741_v60  ;;  %2038 = vrot.lane.b32.xlu1 %v3884_v58, %s2116_s6 }
  0x9f   :  { %v424_v55 = vsel %vm422_vm2, 0.0, %v1746_v19  ;;  %v423_v53 = vsel %vm422_vm2, 0.0, %v1745_v50  ;;  %v3094_v15 = vmax.f32 %v157_v25, %v290_v61  ;;  %v1195_v40 = vsel %vm422_vm2, 0.0, %v1756_v63 }
  0xa0   :  { %v425_v51 = vsel %vm422_vm2, 0.0, %v1755_v43  ;;  %v455_v62 = vmax.f32 %v3900_v57, %v423_v53  ;;  %v456_v54 = vmax.f32 %v3901_v36, %v424_v55  ;;  %v1749_v19 = vpop.permute.xlu0 %1748  ;;  %v1227_v20 = vmax.f32 %v2585_v49, %v1195_v40  ;;  %v1759_v58 = vpop.permute.xlu1 %1758 }
  0xa1   :  { %v457_v50 = vmax.f32 %v2583_v47, %v425_v51  ;;  %v1751_v25 = vunpack.i.h.bf16 %v1749_v19  ;;  %v1750_v61 = vunpack.i.l.bf16 %v1749_v19  ;;  %v1761_v60 = vunpack.i.h.bf16 %v1759_v58 }
  0xa2   :  { %v1760_v48 = vunpack.i.l.bf16 %v1759_v58  ;;  %2043 = vrot.lane.b32.xlu0 %v2633_v4, %s2115_s1  ;;  %v487_v43 = vmax.f32 %v455_v62, %v2169_v8  ;;  %v488_v12 = vmax.f32 %v456_v54, %v2172_v9  ;;  %2048 = vrot.lane.b32.xlu1 %v3894_v56, %s2116_s6  ;;  %v1259_v49 = vmax.f32 %v1227_v20, %v2175_v10 }
  0xa3   :  { %v1194_v14 = vsel %vm422_vm2, 0.0, %v1751_v25  ;;  %v1193_v63 = vsel %vm422_vm2, 0.0, %v1750_v61  ;;  %v489_v47 = vmax.f32 %v457_v50, %v2165_v7  ;;  %v1196_v55 = vsel %vm422_vm2, 0.0, %v1761_v60 }
  0xa4   :  { %v426_v53 = vsel %vm422_vm2, 0.0, %v1760_v48  ;;  %v3902_v40 = vmax.f32 %v2615_v3, 0.0  ;;  %v3903_v9 = vmax.f32 %v2605_v44, 0.0  ;;  %v1764_v57 = vpop.permute.xlu0 %1763  ;;  %v1228_v36 = vmax.f32 %v2618_v31, %v1196_v55  ;;  %v1769_v56 = vpop.permute.xlu1 %1768 }
  0xa5   :  { %v458_v62 = vmax.f32 %v2612_v28, %v426_v53  ;;  %v1766_v54 = vunpack.i.h.bf16 %v1764_v57  ;;  %v1765_v19 = vunpack.i.l.bf16 %v1764_v57  ;;  %v1771_v50 = vunpack.i.h.bf16 %v1769_v56  ;;  %v3904_v28 = vld [vmem:[#allocation11_spill] sm:$0xff] }
  0xa6   :  { %v1226_v8 = vmax.f32 %v3902_v40, %v1194_v14  ;;  %v1225_v51 = vmax.f32 %v3903_v9, %v1193_v63  ;;  %v1770_v20 = vunpack.i.l.bf16 %v1769_v56  ;;  %2053 = vrot.lane.b32.xlu0 %v2601_v24, %s2116_s6  ;;  %2058 = vrot.lane.b32.xlu1 %v2633_v4, %s2116_s6  ;;  %v1260_v58 = vmax.f32 %v1228_v36, %v2195_v17  ;;  %v3907_v56 = vld [vmem:[#allocation66_spill] sm:$0xff] }
  0xa7   :  { %v617_v44 = vsel %vm615_vm3, %v1766_v54, 0.0  ;;  %v616_v3 = vsel %vm615_vm3, %v1765_v19, 0.0  ;;  %v490_v31 = vmax.f32 %v458_v62, %v3904_v28  ;;  %v1386_v25 = vsel %vm615_vm3, %v1771_v50, 0.0  ;;  %v3908_v54 = vld [vmem:[#allocation65_spill] sm:$0xff] }
  0xa8   :  { %v1257_v60 = vmax.f32 %v1225_v51, %v2188_v13  ;;  %v1258_v48 = vmax.f32 %v1226_v8, %v2198_v18  ;;  %v1385_v13 = vsel %vm615_vm3, %v1770_v20, 0.0  ;;  %v648_v18 = vmax.f32 %v487_v43, %v616_v3  ;;  %v1774_v14 = vpop.permute.xlu0 %1773  ;;  %v1779_v55 = vpop.permute.xlu1 %1778  ;;  %v3905_v8 = vld [vmem:[#allocation68_spill] sm:$0xff]  ;;  %v3906_v51 = vld [vmem:[#allocation67_spill] sm:$0xff] }
  0xa9   :  { %v649_v61 = vmax.f32 %v488_v12, %v617_v44  ;;  %v1776_v53 = vunpack.i.h.bf16 %v1774_v14  ;;  %v1775_v40 = vunpack.i.l.bf16 %v1774_v14  ;;  %v1781_v57 = vunpack.i.h.bf16 %v1779_v55 }
  0xaa   :  { %v1417_v63 = vmax.f32 %v1257_v60, %v1385_v13  ;;  %v1418_v24 = vmax.f32 %v1258_v48, %v1386_v25  ;;  %v777_v9 = vmax.f32 %v648_v18, %v3905_v8  ;;  %v1780_v62 = vunpack.i.l.bf16 %v1779_v55 }
  0xab   :  { %v778_v4 = vmax.f32 %v649_v61, %v3906_v51  ;;  %v1197_v50 = vsel %vm422_vm2, 0.0, %v1776_v53  ;;  %v427_v43 = vsel %vm422_vm2, 0.0, %v1775_v40  ;;  %v1387_v60 = vsel %vm615_vm3, %v1781_v57, 0.0  ;;  %v3910_v40 = vld [vmem:[#allocation69_spill] sm:$0xff] }
  0xac   :  { %v1545_v36 = vmax.f32 %v1417_v63, %v3907_v56  ;;  %v1546_v19 = vmax.f32 %v1418_v24, %v3908_v54  ;;  %v809_v12 = vmax.f32 %v777_v9, %v2165_v7  ;;  %v618_v48 = vsel %vm615_vm3, %v1780_v62, 0.0  ;;  %v1784_v44 = vpop.permute.xlu0 %1783  ;;  %v1789_v61 = vpop.permute.xlu1 %1788  ;;  %v3909_v63 = vld [vmem:[#allocation73_spill] sm:$0xff]  ;;  %v3911_v9 = vld [vmem:[#allocation70_spill] sm:$0xff] }
  0xad   :  { %v810_v20 = vmax.f32 %v778_v4, %v3904_v28  ;;  %v650_v13 = vmax.f32 %v489_v47, %v618_v48  ;;  %v1419_v18 = vmax.f32 %v1259_v49, %v1387_v60  ;;  %v1229_v14 = vmax.f32 %v2683_v0, %v1197_v50 }
  0xae   :  { %v1577_v3 = vmax.f32 %v1545_v36, %v2175_v10  ;;  %v1578_v25 = vmax.f32 %v1546_v19, %v2195_v17  ;;  %v459_v24 = vmax.f32 %v3909_v63, %v427_v43  ;;  %v1791_v55 = vunpack.i.h.bf16 %v1789_v61  ;;  %v3912_v43 = vld [vmem:[#allocation43_spill] sm:$0xff] }
  0xaf   :  { %v1790_v7 = vunpack.i.l.bf16 %v1789_v61  ;;  %v779_v8 = vmax.f32 %v650_v13, %v3910_v40  ;;  %v1547_v51 = vmax.f32 %v1419_v18, %v3911_v9  ;;  %v1786_v17 = vunpack.i.h.bf16 %v1784_v44  ;;  %v3914_v13 = vld [vmem:[#allocation71_spill] sm:$0xff]  ;;  %v3915_v40 = vld [vmem:[#allocation13_spill] sm:$0xff]  ;;  %v3916_v9 = vld [vmem:[#allocation12_spill] sm:$0xff] }
  0xb0   :  { %v1609_v53 = vmul.f32 %v1577_v3, %v809_v12  ;;  %v1610_v28 = vmul.f32 %v1578_v25, %v810_v20  ;;  %v1388_v4 = vsel %vm615_vm3, %v1791_v55, 0.0  ;;  %v1785_v47 = vunpack.i.l.bf16 %v1784_v44  ;;  %v1794_v49 = vpop.permute.xlu0 %1793  ;;  %v1799_v36 = vpop.permute.xlu1 %1798  ;;  %v3913_v3 = vld [vmem:[#allocation72_spill] sm:$0xff] }
  0xb1   :  { %v619_v10 = vsel %vm615_vm3, %v1790_v7, 0.0  ;;  %v811_v62 = vmax.f32 %v779_v8, %v2212_v22  ;;  %v1579_v56 = vmax.f32 %v1547_v51, %v2215_v23  ;;  %v1420_v54 = vmax.f32 %v1260_v58, %v1388_v4  ;;  %v3917_v4 = vld [vmem:[#allocation74_spill] sm:$0xff] }
  0xb2   :  { %v1642_v57 = vsel %vm1641_vm4, %v1609_v53, 0.0  ;;  %v1643_v0 = vsel %vm1641_vm4, %v1610_v28, 0.0  ;;  %v651_v19 = vmax.f32 %v490_v31, %v619_v10  ;;  %v1198_v50 = vsel %vm422_vm2, 0.0, %v1786_v17 }
  0xb3   :  { %v1005_v12 = vrot.slane %v3912_v43, 7  ;;  %v1644_v20 = vadd.f32 %v1643_v0, %v1642_v57  ;;  %v1611_v60 = vmul.f32 %v1579_v56, %v811_v62  ;;  %v428_v48 = vsel %vm422_vm2, 0.0, %v1785_v47 }
  0xb4   :  { %v1801_v44 = vunpack.i.h.bf16 %v1799_v36  ;;  %v1548_v25 = vmax.f32 %v1420_v54, %v3913_v3  ;;  %v780_v18 = vmax.f32 %v651_v19, %v3914_v13  ;;  %v1230_v61 = vmax.f32 %v2697_v39, %v1198_v50  ;;  %v1804_v55 = vpop.permute.xlu0 %1803  ;;  %v1809_v28 = vpop.permute.xlu1 %1808 }
  0xb5   :  { %v1800_v63 = vunpack.i.l.bf16 %v1799_v36  ;;  %v1645_v58 = vsel %vm1641_vm4, %v1611_v60, 0.0  ;;  %v491_v7 = vmax.f32 %v459_v24, %v2212_v22  ;;  %v1261_v53 = vmax.f32 %v1229_v14, %v2215_v23  ;;  %v3918_v24 = vld [vmem:[#allocation75_spill] sm:$0xff]  ;;  %v3919_v14 = vld [vmem:[#allocation76_spill] sm:$0xff] }
  0xb6   :  { %v1389_v31 = vsel %vm615_vm3, %v1801_v44, 0.0  ;;  %v1580_v8 = vmax.f32 %v1548_v25, %v3915_v40  ;;  %v812_v51 = vmax.f32 %v780_v18, %v3916_v9  ;;  %v460_v10 = vmax.f32 %v3917_v4, %v428_v48  ;;  %v3920_v25 = vld [vmem:[#allocation79_spill] sm:$0xff] }
  0xb7   :  { %v620_v17 = vsel %vm615_vm3, %v1800_v63, 0.0  ;;  %v1421_v47 = vmax.f32 %v1261_v53, %v1389_v31  ;;  %v1796_v57 = vunpack.i.h.bf16 %v1794_v49  ;;  %v1795_v0 = vunpack.i.l.bf16 %v1794_v49 }
  0xb8   :  { %v652_v39 = vmax.f32 %v491_v7, %v620_v17  ;;  %v1646_v62 = vadd.f32 %v1645_v58, %v1644_v20  ;;  %v1612_v56 = vmul.f32 %v1580_v8, %v812_v51  ;;  %v1811_v36 = vunpack.i.h.bf16 %v1809_v28  ;;  %v1814_v22 = vpop.permute.xlu0 %1813  ;;  %v1819_v48 = vpop.permute.xlu1 %1818 }
  0xb9   :  { %v1810_v54 = vunpack.i.l.bf16 %v1809_v28  ;;  %v1549_v19 = vmax.f32 %v1421_v47, %v3919_v14  ;;  %v1199_v50 = vsel %vm422_vm2, 0.0, %v1796_v57  ;;  %v429_v60 = vsel %vm422_vm2, 0.0, %v1795_v0 }
  0xba   :  { %v781_v23 = vmax.f32 %v652_v39, %v3918_v24  ;;  %v1647_v44 = vsel %vm1641_vm4, %v1612_v56, 0.0  ;;  %v1231_v3 = vmax.f32 %v2727_v5, %v1199_v50  ;;  %v461_v49 = vmax.f32 %v3920_v25, %v429_v60 }
  0xbb   :  { %v492_v20 = vmax.f32 %v460_v10, %v3916_v9  ;;  %v1581_v18 = vmax.f32 %v1549_v19, %v2237_v30  ;;  %v1390_v63 = vsel %vm615_vm3, %v1811_v36, 0.0  ;;  %v621_v58 = vsel %vm615_vm3, %v1810_v54, 0.0  ;;  %v3921_v9 = vld [vmem:[#allocation77_spill] sm:$0xff] }
  0xbc   :  { %v813_v13 = vmax.f32 %v781_v23, %v2233_v29  ;;  %v1262_v7 = vmax.f32 %v1230_v61, %v3915_v40  ;;  %v1806_v53 = vunpack.i.h.bf16 %v1804_v55  ;;  %v1805_v28 = vunpack.i.l.bf16 %v1804_v55  ;;  %v1824_v8 = vpop.permute.xlu0 %1823  ;;  %v1829_v39 = vpop.permute.xlu1 %1828 }
  0xbd   :  { %v653_v31 = vmax.f32 %v492_v20, %v621_v58  ;;  %v1648_v51 = vadd.f32 %v1647_v44, %v1646_v62  ;;  %v1821_v4 = vunpack.i.h.bf16 %v1819_v48  ;;  %v1820_v17 = vunpack.i.l.bf16 %v1819_v48  ;;  %v3922_v62 = vld [vmem:[#allocation78_spill] sm:$0xff] }
  0xbe   :  { %v1613_v5 = vmul.f32 %v1581_v18, %v813_v13  ;;  %v1422_v47 = vmax.f32 %v1262_v7, %v1390_v63  ;;  %v1200_v57 = vsel %vm422_vm2, 0.0, %v1806_v53  ;;  %v430_v0 = vsel %vm422_vm2, 0.0, %v1805_v28  ;;  %v3924_v7 = vld [vmem:[#allocation84_spill] sm:$0xff]  ;;  %v3925_v28 = vld [vmem:[#allocation81_spill] sm:$0xff] }
  0xbf   :  { %v782_v10 = vmax.f32 %v653_v31, %v3921_v9  ;;  %v1232_v36 = vmax.f32 %v2737_v27, %v1200_v57  ;;  %v462_v61 = vmax.f32 %v2732_v26, %v430_v0  ;;  %v493_v55 = vmax.f32 %v461_v49, %v2233_v29  ;;  %v3923_v49 = vld [vmem:[#allocation80_spill] sm:$0xff] }
  0xc0   :  { %v1649_v56 = vsel %vm1641_vm4, %v1613_v5, 0.0  ;;  %v1550_v54 = vmax.f32 %v1422_v47, %v3922_v62  ;;  %v1391_v24 = vsel %vm615_vm3, %v1821_v4, 0.0  ;;  %v622_v23 = vsel %vm615_vm3, %v1820_v17, 0.0  ;;  %v3195_v14 = vpop.permute.xlu0 %1833  ;;  %v1839_v27 = vpop.permute.xlu1 %1838 }
  0xc1   :  { %v814_v40 = vmax.f32 %v782_v10, %v2247_v34  ;;  %v654_v19 = vmax.f32 %v493_v55, %v622_v23  ;;  %v1263_v50 = vmax.f32 %v1231_v3, %v2237_v30  ;;  %v1816_v60 = vunpack.i.h.bf16 %v1814_v22  ;;  %v3926_v55 = vld [vmem:[#allocation82_spill] sm:$0xff] }
  0xc2   :  { %v1815_v48 = vunpack.i.l.bf16 %v1814_v22  ;;  %v1650_v44 = vadd.f32 %v1649_v56, %v1648_v51  ;;  %v1582_v26 = vmax.f32 %v1550_v54, %v2250_v35  ;;  %v1831_v29 = vunpack.i.h.bf16 %v1829_v39 }
  0xc3   :  { %v1830_v25 = vunpack.i.l.bf16 %v1829_v39  ;;  %v783_v20 = vmax.f32 %v654_v19, %v3923_v49  ;;  %v1423_v13 = vmax.f32 %v1263_v50, %v1391_v24  ;;  %v494_v63 = vmax.f32 %v462_v61, %v2247_v34  ;;  %v3928_v50 = vld [vmem:[#allocation14_spill] sm:$0xff] }
  0xc4   :  { %v431_v18 = vsel %vm422_vm2, 0.0, %v1815_v48  ;;  %v1614_v58 = vmul.f32 %v1582_v26, %v814_v40  ;;  %v1201_v31 = vsel %vm422_vm2, 0.0, %v1816_v60  ;;  %v1392_v22 = vsel %vm615_vm3, %v1831_v29, 0.0  ;;  %v3205_v3 = vpop.permute.xlu0 %1843  ;;  %v1849_v17 = vpop.permute.xlu1 %1848  ;;  %v3929_v29 = vld [vmem:[#allocation15_spill] sm:$0xff] }
  0xc5   :  { %v463_v30 = vmax.f32 %v3924_v7, %v431_v18  ;;  %v815_v53 = vmax.f32 %v783_v20, %v2258_v37  ;;  %v1551_v51 = vmax.f32 %v1423_v13, %v3925_v28  ;;  %v623_v5 = vsel %vm615_vm3, %v1830_v25, 0.0  ;;  %v3931_v28 = vld [vmem:[#allocation86_spill] sm:$0xff] }
  0xc6   :  { %v1264_v4 = vmax.f32 %v1232_v36, %v2250_v35  ;;  %v1651_v34 = vsel %vm1641_vm4, %v1614_v58, 0.0  ;;  %v655_v39 = vmax.f32 %v494_v63, %v623_v5  ;;  %v1826_v9 = vunpack.i.h.bf16 %v1824_v8  ;;  %v3927_v35 = vld [vmem:[#allocation83_spill] sm:$0xff] }
  0xc7   :  { %v1825_v10 = vunpack.i.l.bf16 %v1824_v8  ;;  %v1583_v47 = vmax.f32 %v1551_v51, %v2263_v38  ;;  %v1233_v57 = vmax.f32 %v2767_v1, %v1201_v31  ;;  %v1841_v56 = vunpack.i.h.bf16 %v1839_v27 }
  0xc8   :  { %v1424_v0 = vmax.f32 %v1264_v4, %v1392_v22  ;;  %v1652_v61 = vadd.f32 %v1651_v34, %v1650_v44  ;;  %v784_v40 = vmax.f32 %v655_v39, %v3926_v55  ;;  %v1840_v54 = vunpack.i.l.bf16 %v1839_v27  ;;  %v1859_v8 = vpop.permute.xlu1 %1858  ;;  %v3223_v26 = vpop.permute.xlu0 %1853  ;;  %v3932_v34 = vld [vmem:[#allocation87_spill] sm:$0xff] }
  0xc9   :  { %v432_v62 = vsel %vm422_vm2, 0.0, %v1825_v10  ;;  %v1615_v24 = vmul.f32 %v1583_v47, %v815_v53  ;;  %v1202_v23 = vsel %vm422_vm2, 0.0, %v1826_v9  ;;  %v1393_v1 = vsel %vm615_vm3, %v1841_v56, 0.0  ;;  %v3933_v47 = vld [vmem:[#allocation90_spill] sm:$0xff] }
  0xca   :  { %v1552_v36 = vmax.f32 %v1424_v0, %v3927_v35  ;;  %v464_v19 = vmax.f32 %v2774_v21, %v432_v62  ;;  %v816_v60 = vmax.f32 %v784_v40, %v3928_v50  ;;  %v495_v48 = vmax.f32 %v463_v30, %v2258_v37  ;;  %v3930_v21 = vld [vmem:[#allocation85_spill] sm:$0xff] }
  0xcb   :  { %v624_v44 = vsel %vm615_vm3, %v1840_v54, 0.0  ;;  %v1653_v27 = vsel %vm1641_vm4, %v1615_v24, 0.0  ;;  %v1265_v49 = vmax.f32 %v1233_v57, %v2263_v38  ;;  %v1836_v20 = vunpack.i.h.bf16 %v3195_v14 }
  0xcc   :  { %v1584_v25 = vmax.f32 %v1552_v36, %v3929_v29  ;;  %v1234_v13 = vmax.f32 %v3930_v21, %v1202_v23  ;;  %v656_v18 = vmax.f32 %v495_v48, %v624_v44  ;;  %v1835_v63 = vunpack.i.l.bf16 %v3195_v14  ;;  %v1869_v22 = vpop.permute.xlu1 %1868  ;;  %v1864_v56 = vpop.permute.xlu0 %1863  ;;  %v3935_v48 = vld [vmem:[#allocation89_spill] sm:$0xff] }
  0xcd   :  { %v1851_v58 = vunpack.i.h.bf16 %v1849_v17  ;;  %v1425_v37 = vmax.f32 %v1265_v49, %v1393_v1  ;;  %v1203_v7 = vsel %vm422_vm2, 0.0, %v1836_v20  ;;  %v1850_v30 = vunpack.i.l.bf16 %v1849_v17  ;;  %v3937_v20 = vld [vmem:[#allocation16_spill] sm:$0xff] }
  0xce   :  { %v1616_v31 = vmul.f32 %v1584_v25, %v816_v60  ;;  %v1654_v53 = vadd.f32 %v1653_v27, %v1652_v61  ;;  %v785_v51 = vmax.f32 %v656_v18, %v3931_v28  ;;  %v1235_v5 = vmax.f32 %v2811_v52, %v1203_v7  ;;  %v3936_v27 = vld [vmem:[#allocation91_spill] sm:$0xff]  ;;  %v3938_v18 = vld [vmem:[#allocation17_spill] sm:$0xff] }
  0xcf   :  { %v433_v38 = vsel %vm422_vm2, 0.0, %v1835_v63  ;;  %v1553_v39 = vmax.f32 %v1425_v37, %v3932_v34  ;;  %v1394_v14 = vsel %vm615_vm3, %v1851_v58, 0.0  ;;  %v496_v9 = vmax.f32 %v464_v19, %v3928_v50  ;;  %v3934_v19 = vld [vmem:[#allocation88_spill] sm:$0xff]  ;;  %v3940_v34 = vld [vmem:[#allocation93_spill] sm:$0xff] }
  0xd0   :  { %v1655_v4 = vsel %vm1641_vm4, %v1616_v31, 0.0  ;;  %v817_v10 = vmax.f32 %v785_v51, %v2283_v45  ;;  %v465_v17 = vmax.f32 %v3933_v47, %v433_v38  ;;  %v625_v57 = vsel %vm615_vm3, %v1850_v30, 0.0  ;;  %v1879_v36 = vpop.permute.xlu1 %1878  ;;  %v3939_v58 = vld [vmem:[#allocation92_spill] sm:$0xff]  ;;  %v1874_v30 = vpop.permute.xlu0 %1873 }
  0xd1   :  { %v1266_v0 = vmax.f32 %v1234_v13, %v3929_v29  ;;  %v1585_v52 = vmax.f32 %v1553_v39, %v2289_v46  ;;  %v657_v61 = vmax.f32 %v496_v9, %v625_v57  ;;  %v1846_v55 = vunpack.i.h.bf16 %v3205_v3 }
  0xd2   :  { %v1845_v40 = vunpack.i.l.bf16 %v3205_v3  ;;  %v1656_v62 = vadd.f32 %v1655_v4, %v1654_v53  ;;  %v1861_v24 = vunpack.i.h.bf16 %v1859_v8  ;;  %v1860_v35 = vunpack.i.l.bf16 %v1859_v8 }
  0xd3   :  { %v1426_v54 = vmax.f32 %v1266_v0, %v1394_v14  ;;  %v1617_v23 = vmul.f32 %v1585_v52, %v817_v10  ;;  %v786_v50 = vmax.f32 %v657_v61, %v3934_v19  ;;  %v1204_v60 = vsel %vm422_vm2, 0.0, %v1846_v55  ;;  %v3944_v55 = vld [vmem:[#allocation19_spill] sm:$0xff] }
  0xd4   :  { %v434_v1 = vsel %vm422_vm2, 0.0, %v1845_v40  ;;  %v1395_v25 = vsel %vm615_vm3, %v1861_v24, 0.0  ;;  %v497_v3 = vmax.f32 %v465_v17, %v2283_v45  ;;  %v626_v21 = vsel %vm615_vm3, %v1860_v35, 0.0 }
  0xd5   :  { %v1554_v44 = vmax.f32 %v1426_v54, %v3935_v48  ;;  %v466_v29 = vmax.f32 %v3936_v27, %v434_v1  ;;  %v1657_v49 = vsel %vm1641_vm4, %v1617_v23, 0.0  ;;  %v818_v8 = vmax.f32 %v786_v50, %v3937_v20  ;;  %v1884_v1 = vpop.permute.xlu0 %1883  ;;  %v3946_v27 = vld [vmem:[#allocation95_spill] sm:$0xff] }
  0xd6   :  { %v1267_v13 = vmax.f32 %v1235_v5, %v2289_v46  ;;  %v1236_v31 = vmax.f32 %v3939_v58, %v1204_v60  ;;  %v658_v37 = vmax.f32 %v497_v3, %v626_v21  ;;  %v1856_v7 = vunpack.i.h.bf16 %v3223_v26  ;;  %v1889_v46 = vpop.permute.xlu1 %1888  ;;  %v3941_v5 = vld [vmem:[#allocation94_spill] sm:$0xff] }
  0xd7   :  { %v1586_v63 = vmax.f32 %v1554_v44, %v3938_v18  ;;  %v1855_v28 = vunpack.i.l.bf16 %v3223_v26  ;;  %v1871_v45 = vunpack.i.h.bf16 %v1869_v22  ;;  %v1870_v51 = vunpack.i.l.bf16 %v1869_v22  ;;  %v3942_v26 = vld [vmem:[#allocation18_spill] sm:$0xff]  ;;  %v3943_v22 = vld [vmem:[#allocation97_spill] sm:$0xff] }
  0xd8   :  { %v1427_v53 = vmax.f32 %v1267_v13, %v1395_v25  ;;  %v1658_v38 = vadd.f32 %v1657_v49, %v1656_v62  ;;  %v787_v39 = vmax.f32 %v658_v37, %v3940_v34  ;;  %v1205_v14 = vsel %vm422_vm2, 0.0, %v1856_v7  ;;  %v3945_v62 = vld [vmem:[#allocation98_spill] sm:$0xff]  ;;  %v3950_v7 = vld [vmem:[#allocation99_spill] sm:$0xff] }
  0xd9   :  { %v1618_v4 = vmul.f32 %v1586_v63, %v818_v8  ;;  %v435_v10 = vsel %vm422_vm2, 0.0, %v1855_v28  ;;  %v1396_v47 = vsel %vm615_vm3, %v1871_v45, 0.0  ;;  %v498_v17 = vmax.f32 %v466_v29, %v3937_v20 }
  0xda   :  { %v1555_v9 = vmax.f32 %v1427_v53, %v3941_v5  ;;  %v819_v0 = vmax.f32 %v787_v39, %v3942_v26  ;;  %v467_v52 = vmax.f32 %v3943_v22, %v435_v10  ;;  %v627_v61 = vsel %vm615_vm3, %v1870_v51, 0.0  ;;  %v1899_v21 = vpop.permute.xlu1 %1898  ;;  %v3951_v51 = vld [vmem:[#allocation21_spill] sm:$0xff] }
  0xdb   :  { %v1659_v57 = vsel %vm1641_vm4, %v1618_v4, 0.0  ;;  %v1237_v54 = vmax.f32 %v3945_v62, %v1205_v14  ;;  %v659_v24 = vmax.f32 %v498_v17, %v627_v61  ;;  %v1268_v35 = vmax.f32 %v1236_v31, %v3938_v18  ;;  %v3949_v31 = vld [vmem:[#allocation100_spill] sm:$0xff]  ;;  %v3952_v5 = vld [vmem:[#allocation101_spill] sm:$0xff]  ;;  %v1894_v17 = vpop.permute.xlu0 %1893 }
  0xdc   :  { %v1587_v40 = vmax.f32 %v1555_v9, %v3944_v55  ;;  %v1866_v23 = vunpack.i.h.bf16 %v1864_v56  ;;  %v1865_v19 = vunpack.i.l.bf16 %v1864_v56  ;;  %v1881_v50 = vunpack.i.h.bf16 %v1879_v36  ;;  %v3947_v56 = vld [vmem:[#allocation20_spill] sm:$0xff] }
  0xdd   :  { %v1880_v60 = vunpack.i.l.bf16 %v1879_v36  ;;  %v1660_v48 = vadd.f32 %v1659_v57, %v1658_v38  ;;  %v788_v29 = vmax.f32 %v659_v24, %v3946_v27  ;;  %v1428_v25 = vmax.f32 %v1268_v35, %v1396_v47  ;;  %v3948_v36 = vld [vmem:[#allocation96_spill] sm:$0xff] }
  0xde   :  { %v1619_v44 = vmul.f32 %v1587_v40, %v819_v0  ;;  %v1206_v3 = vsel %vm422_vm2, 0.0, %v1866_v23  ;;  %v436_v49 = vsel %vm422_vm2, 0.0, %v1865_v19  ;;  %v499_v20 = vmax.f32 %v467_v52, %v3942_v26  ;;  %v3953_v52 = vld [vmem:[#allocation22_spill] sm:$0xff]  ;;  %v3955_v62 = vld [vmem:[#allocation44_spill] sm:$0xff]  ;;  %v1909_v24 = vpop.permute.xlu1 %1908 }
  0xdf   :  { %v628_v8 = vsel %vm615_vm3, %v1880_v60, 0.0  ;;  %v820_v18 = vmax.f32 %v788_v29, %v3947_v56  ;;  %v1556_v63 = vmax.f32 %v1428_v25, %v3948_v36  ;;  %v1397_v58 = vsel %vm615_vm3, %v1881_v50, 0.0  ;;  %v3956_v50 = vld [vmem:[#allocation23_spill] sm:$0xff] }
  0xe0   :  { %v1661_v13 = vsel %vm1641_vm4, %v1619_v44, 0.0  ;;  %v1238_v37 = vmax.f32 %v3949_v31, %v1206_v3  ;;  %v468_v53 = vmax.f32 %v3950_v7, %v436_v49  ;;  %v660_v28 = vmax.f32 %v499_v20, %v628_v8 }
  0xe1   :  { %v1269_v45 = vmax.f32 %v1237_v54, %v3944_v55  ;;  %v1588_v38 = vmax.f32 %v1556_v63, %v3951_v51  ;;  %v1876_v4 = vunpack.i.h.bf16 %v1874_v30  ;;  %v1875_v34 = vunpack.i.l.bf16 %v1874_v30  ;;  %v3954_v55 = vld [vmem:[#allocation102_spill] sm:$0xff]  ;;  %v1904_v63 = vpop.permute.xlu0 %1903 }
  0xe2   :  { %v1891_v39 = vunpack.i.h.bf16 %v1889_v46  ;;  %v1662_v14 = vadd.f32 %v1661_v13, %v1660_v48  ;;  %v789_v9 = vmax.f32 %v660_v28, %v3952_v5  ;;  %v1890_v47 = vunpack.i.l.bf16 %v1889_v46  ;;  %v3957_v48 = vld [vmem:[#allocation105_spill] sm:$0xff]  ;;  %v3958_v13 = vld [vmem:[#allocation103_spill] sm:$0xff] }
  0xe3   :  { %v1429_v10 = vmax.f32 %v1269_v45, %v1397_v58  ;;  %v1620_v57 = vmul.f32 %v1588_v38, %v820_v18  ;;  %v1207_v26 = vsel %vm422_vm2, 0.0, %v1876_v4  ;;  %v437_v0 = vsel %vm422_vm2, 0.0, %v1875_v34  ;;  %v3959_v58 = vld [vmem:[#allocation104_spill] sm:$0xff]  ;;  %v1919_v4 = vpop.permute.xlu1 %1918  ;;  %v3962_v34 = vld [vmem:[#allocation25_spill] sm:$0xff] }
  0xe4   :  { %v500_v22 = vmax.f32 %v468_v53, %v3947_v56  ;;  %v821_v61 = vmax.f32 %v789_v9, %v3953_v52  ;;  %v469_v30 = vmax.f32 %v3955_v62, %v437_v0  ;;  %v1398_v54 = vsel %vm615_vm3, %v1891_v39, 0.0  ;;  %v3961_v45 = vld [vmem:[#allocation24_spill] sm:$0xff]  ;;  %v3965_v62 = vld [vmem:[#allocation47_spill] sm:$0xff] }
  0xe5   :  { %v1557_v40 = vmax.f32 %v1429_v10, %v3954_v55  ;;  %v1663_v35 = vsel %vm1641_vm4, %v1620_v57, 0.0  ;;  %v629_v46 = vsel %vm615_vm3, %v1890_v47, 0.0  ;;  %v1270_v23 = vmax.f32 %v1238_v37, %v3951_v51  ;;  %v3960_v37 = vld [vmem:[#allocation106_spill] sm:$0xff] }
  0xe6   :  { %v1886_v19 = vunpack.i.h.bf16 %v1884_v1  ;;  %v1239_v44 = vmax.f32 %v3957_v48, %v1207_v26  ;;  %v661_v27 = vmax.f32 %v500_v22, %v629_v46  ;;  %v1885_v29 = vunpack.i.l.bf16 %v1884_v1 }
  0xe7   :  { %v1589_v60 = vmax.f32 %v1557_v40, %v3956_v50  ;;  %v1664_v25 = vadd.f32 %v1663_v35, %v1662_v14  ;;  %v1430_v3 = vmax.f32 %v1270_v23, %v1398_v54  ;;  %v1901_v49 = vunpack.i.h.bf16 %v1899_v21  ;;  %v3963_v14 = vld [vmem:[#allocation107_spill] sm:$0xff]  ;;  %v1914_v23 = vpop.permute.xlu0 %1913 }
  0xe8   :  { %v1900_v20 = vunpack.i.l.bf16 %v1899_v21  ;;  %v790_v56 = vmax.f32 %v661_v27, %v3958_v13  ;;  %v1208_v18 = vsel %vm422_vm2, 0.0, %v1886_v19  ;;  %v438_v36 = vsel %vm422_vm2, 0.0, %v1885_v29  ;;  %v3969_v29 = vld [vmem:[#allocation112_spill] sm:$0xff] }
  0xe9   :  { %v1621_v8 = vmul.f32 %v1589_v60, %v821_v61  ;;  %v1558_v31 = vmax.f32 %v1430_v3, %v3959_v58  ;;  %v470_v7 = vmax.f32 %v3960_v37, %v438_v36  ;;  %v1399_v53 = vsel %vm615_vm3, %v1901_v49, 0.0  ;;  %v3964_v61 = vld [vmem:[#allocation108_spill] sm:$0xff] }
  0xea   :  { %v501_v1 = vmax.f32 %v469_v30, %v3953_v52  ;;  %v822_v21 = vmax.f32 %v790_v56, %v3961_v45  ;;  %v630_v51 = vsel %vm615_vm3, %v1900_v20, 0.0  ;;  %v1271_v38 = vmax.f32 %v1239_v44, %v3956_v50  ;;  %v3968_v44 = vld [vmem:[#allocation27_spill] sm:$0xff]  ;;  %v1929_v20 = vpop.permute.xlu1 %1928 }
  0xeb   :  { %v1665_v28 = vsel %vm1641_vm4, %v1621_v8, 0.0  ;;  %v1590_v39 = vmax.f32 %v1558_v31, %v3962_v34  ;;  %v1240_v5 = vmax.f32 %v3963_v14, %v1208_v18  ;;  %v1896_v10 = vunpack.i.h.bf16 %v1894_v17  ;;  %v3970_v31 = vld [vmem:[#allocation109_spill] sm:$0xff] }
  0xec   :  { %v662_v9 = vmax.f32 %v501_v1, %v630_v51  ;;  %v1431_v47 = vmax.f32 %v1271_v38, %v1399_v53  ;;  %v1895_v57 = vunpack.i.l.bf16 %v1894_v17  ;;  %v1911_v26 = vunpack.i.h.bf16 %v1909_v24  ;;  %v3966_v17 = vld [vmem:[#allocation26_spill] sm:$0xff]  ;;  %v3971_v51 = vld [vmem:[#allocation28_spill] sm:$0xff]  ;;  %v3973_v14 = vld [vmem:[#allocation113_spill] sm:$0xff] }
  0xed   :  { %v1910_v0 = vunpack.i.l.bf16 %v1909_v24  ;;  %v1666_v22 = vadd.f32 %v1665_v28, %v1664_v25  ;;  %v1622_v52 = vmul.f32 %v1590_v39, %v822_v21  ;;  %v1209_v40 = vsel %vm422_vm2, 0.0, %v1896_v10  ;;  %v3967_v24 = vld [vmem:[#allocation111_spill] sm:$0xff]  ;;  %v1924_v39 = vpop.permute.xlu0 %1923 }
  0xee   :  { %v791_v55 = vmax.f32 %v662_v9, %v3964_v61  ;;  %v1559_v30 = vmax.f32 %v1431_v47, %v3965_v62  ;;  %v439_v54 = vsel %vm422_vm2, 0.0, %v1895_v57  ;;  %v1400_v35 = vsel %vm615_vm3, %v1911_v26, 0.0  ;;  %v3974_v9 = vld [vmem:[#allocation50_spill] sm:$0xff]  ;;  %v3975_v26 = vld [vmem:[#allocation29_spill] sm:$0xff] }
  0xef   :  { %v502_v46 = vmax.f32 %v470_v7, %v3961_v45  ;;  %v1667_v19 = vsel %vm1641_vm4, %v1622_v52, 0.0  ;;  %v471_v60 = vmax.f32 %v3967_v24, %v439_v54  ;;  %v631_v48 = vsel %vm615_vm3, %v1910_v0, 0.0  ;;  %v3976_v62 = vld [vmem:[#allocation114_spill] sm:$0xff] }
  0xf0   :  { %v823_v50 = vmax.f32 %v791_v55, %v3966_v17  ;;  %v1591_v27 = vmax.f32 %v1559_v30, %v3968_v44  ;;  %v1241_v25 = vmax.f32 %v3969_v29, %v1209_v40  ;;  %v1272_v49 = vmax.f32 %v1240_v5, %v3962_v34  ;;  %v1939_v55 = vpop.permute.xlu1 %1938  ;;  %v3977_v24 = vld [vmem:[#allocation30_spill] sm:$0xff] }
  0xf1   :  { %v663_v3 = vmax.f32 %v502_v46, %v631_v48  ;;  %v1906_v8 = vunpack.i.h.bf16 %v1904_v63  ;;  %v1905_v13 = vunpack.i.l.bf16 %v1904_v63  ;;  %v1921_v56 = vunpack.i.h.bf16 %v1919_v4  ;;  %v3972_v63 = vld [vmem:[#allocation110_spill] sm:$0xff]  ;;  %v3978_v48 = vld [vmem:[#allocation115_spill] sm:$0xff] }
  0xf2   :  { %v1920_v18 = vunpack.i.l.bf16 %v1919_v4  ;;  %v1668_v36 = vadd.f32 %v1667_v19, %v1666_v22  ;;  %v1623_v58 = vmul.f32 %v1591_v27, %v823_v50  ;;  %v1432_v7 = vmax.f32 %v1272_v49, %v1400_v35  ;;  %v3979_v27 = vld [vmem:[#allocation53_spill] sm:$0xff] }
  0xf3   :  { %v792_v37 = vmax.f32 %v663_v3, %v3970_v31  ;;  %v1210_v53 = vsel %vm422_vm2, 0.0, %v1906_v8  ;;  %v440_v1 = vsel %vm422_vm2, 0.0, %v1905_v13  ;;  %v503_v28 = vmax.f32 %v471_v60, %v3966_v17  ;;  %v1934_v8 = vpop.permute.xlu0 %1933  ;;  %v3980_v13 = vld [vmem:[#allocation31_spill] sm:$0xff] }
  0xf4   :  { %v632_v45 = vsel %vm615_vm3, %v1920_v18, 0.0  ;;  %v1669_v21 = vsel %vm1641_vm4, %v1623_v58, 0.0  ;;  %v1560_v34 = vmax.f32 %v1432_v7, %v3972_v63  ;;  %v1401_v4 = vsel %vm615_vm3, %v1921_v56, 0.0  ;;  %v3981_v18 = vld [vmem:[#allocation118_spill] sm:$0xff] }
  0xf5   :  { %v824_v38 = vmax.f32 %v792_v37, %v3971_v51  ;;  %v1242_v5 = vmax.f32 %v3973_v14, %v1210_v53  ;;  %v472_v10 = vmax.f32 %v3974_v9, %v440_v1  ;;  %v664_v47 = vmax.f32 %v503_v28, %v632_v45  ;;  %v1949_v28 = vpop.permute.xlu1 %1948  ;;  %v3984_v14 = vld [vmem:[#allocation119_spill] sm:$0xff] }
  0xf6   :  { %v1273_v57 = vmax.f32 %v1241_v25, %v3968_v44  ;;  %v1592_v0 = vmax.f32 %v1560_v34, %v3975_v26  ;;  %v1916_v22 = vunpack.i.h.bf16 %v1914_v23  ;;  %v1915_v52 = vunpack.i.l.bf16 %v1914_v23  ;;  %v3983_v34 = vld [vmem:[#allocation117_spill] sm:$0xff] }
  0xf7   :  { %v1931_v61 = vunpack.i.h.bf16 %v1929_v20  ;;  %v1670_v40 = vadd.f32 %v1669_v21, %v1668_v36  ;;  %v793_v30 = vmax.f32 %v664_v47, %v3976_v62  ;;  %v1930_v35 = vunpack.i.l.bf16 %v1929_v20  ;;  %v3982_v21 = vld [vmem:[#allocation116_spill] sm:$0xff] }
  0xf8   :  { %v1433_v54 = vmax.f32 %v1273_v57, %v1401_v4  ;;  %v1624_v46 = vmul.f32 %v1592_v0, %v824_v38  ;;  %v1211_v19 = vsel %vm422_vm2, 0.0, %v1916_v22  ;;  %v441_v17 = vsel %vm422_vm2, 0.0, %v1915_v52  ;;  %v3985_v47 = vld [vmem:[#allocation32_spill] sm:$0xff]  ;;  %v3986_v22 = vld [vmem:[#allocation33_spill] sm:$0xff] }
  0xf9   :  { %v504_v50 = vmax.f32 %v472_v10, %v3971_v51  ;;  %v825_v60 = vmax.f32 %v793_v30, %v3977_v24  ;;  %v473_v23 = vmax.f32 %v3979_v27, %v441_v17  ;;  %v1402_v29 = vsel %vm615_vm3, %v1931_v61, 0.0  ;;  %v3987_v61 = vld [vmem:[#allocation120_spill] sm:$0xff]  ;;  %v1944_v30 = vpop.permute.xlu0 %1943 }
  0xfa   :  { %v1561_v44 = vmax.f32 %v1433_v54, %v3978_v48  ;;  %v1671_v25 = vsel %vm1641_vm4, %v1624_v46, 0.0  ;;  %v633_v3 = vsel %vm615_vm3, %v1930_v35, 0.0  ;;  %v1274_v49 = vmax.f32 %v1242_v5, %v3975_v26  ;;  %v3989_v27 = vld [vmem:[#allocation56_spill] sm:$0xff] }
  0xfb   :  { %v1926_v20 = vunpack.i.h.bf16 %v1924_v39  ;;  %v1243_v36 = vmax.f32 %v3981_v18, %v1211_v19  ;;  %v665_v58 = vmax.f32 %v504_v50, %v633_v3  ;;  %v1925_v31 = vunpack.i.l.bf16 %v1924_v39 }
  0xfc   :  { %v1593_v56 = vmax.f32 %v1561_v44, %v3980_v13  ;;  %v1672_v37 = vadd.f32 %v1671_v25, %v1670_v40  ;;  %v1434_v7 = vmax.f32 %v1274_v49, %v1402_v29  ;;  %v1941_v53 = vunpack.i.h.bf16 %v1939_v55  ;;  %v1959_v44 = vpop.permute.xlu1 %1958 }
  0xfd   :  { %v1940_v1 = vunpack.i.l.bf16 %v1939_v55  ;;  %v794_v51 = vmax.f32 %v665_v58, %v3982_v21  ;;  %v1212_v38 = vsel %vm422_vm2, 0.0, %v1926_v20  ;;  %v442_v63 = vsel %vm422_vm2, 0.0, %v1925_v31  ;;  %v3990_v20 = vld [vmem:[#allocation34_spill] sm:$0xff]  ;;  %v3993_v31 = vld [vmem:[#allocation125_spill] sm:$0xff] }
  0xfe   :  { %v1625_v45 = vmul.f32 %v1593_v56, %v825_v60  ;;  %v1562_v4 = vmax.f32 %v1434_v7, %v3983_v34  ;;  %v474_v5 = vmax.f32 %v3984_v14, %v442_v63  ;;  %v1403_v9 = vsel %vm615_vm3, %v1941_v53, 0.0  ;;  %v3994_v34 = vld [vmem:[#allocation122_spill] sm:$0xff] }
  0xff   :  { %v505_v39 = vmax.f32 %v473_v23, %v3977_v24  ;;  %v826_v57 = vmax.f32 %v794_v51, %v3985_v47  ;;  %v634_v26 = vsel %vm615_vm3, %v1940_v1, 0.0  ;;  %v1275_v0 = vmax.f32 %v1243_v36, %v3980_v13  ;;  %v3988_v24 = vld [vmem:[#allocation121_spill] sm:$0xff]  ;;  %v3991_v13 = vld [vmem:[#allocation124_spill] sm:$0xff]  ;;  %v3992_v36 = vld [vmem:[#allocation35_spill] sm:$0xff]  ;;  %v1954_v51 = vpop.permute.xlu0 %1953 }
 0x100   :  { %v1673_v10 = vsel %vm1641_vm4, %v1625_v45, 0.0  ;;  %v1594_v52 = vmax.f32 %v1562_v4, %v3986_v22  ;;  %v1244_v55 = vmax.f32 %v3987_v61, %v1212_v38  ;;  %v1936_v62 = vunpack.i.h.bf16 %v1934_v8 }
 0x101   :  { %v666_v40 = vmax.f32 %v505_v39, %v634_v26  ;;  %v1435_v54 = vmax.f32 %v1275_v0, %v1403_v9  ;;  %v1935_v35 = vunpack.i.l.bf16 %v1934_v8  ;;  %v1951_v46 = vunpack.i.h.bf16 %v1949_v28  ;;  %v3995_v26 = vld [vmem:[#allocation36_spill] sm:$0xff] }
 0x102   :  { %v1950_v19 = vunpack.i.l.bf16 %v1949_v28  ;;  %v1674_v17 = vadd.f32 %v1673_v10, %v1672_v37  ;;  %v1626_v50 = vmul.f32 %v1594_v52, %v826_v57  ;;  %v1213_v48 = vsel %vm422_vm2, 0.0, %v1936_v62  ;;  %v3998_v62 = vld [vmem:[#allocation59_spill] sm:$0xff] }
 0x103   :  { %v795_v60 = vmax.f32 %v666_v40, %v3988_v24  ;;  %v1563_v23 = vmax.f32 %v1435_v54, %v3989_v27  ;;  %v443_v29 = vsel %vm422_vm2, 0.0, %v1935_v35  ;;  %v1404_v25 = vsel %vm615_vm3, %v1951_v46, 0.0  ;;  %v3999_v46 = vld [vmem:[#allocation37_spill] sm:$0xff] }
 0x104   :  { %v506_v3 = vmax.f32 %v474_v5, %v3985_v47  ;;  %v1675_v49 = vsel %vm1641_vm4, %v1626_v50, 0.0  ;;  %v475_v56 = vmax.f32 %v3991_v13, %v443_v29  ;;  %v635_v18 = vsel %vm615_vm3, %v1950_v19, 0.0  ;;  %v1969_v47 = vpop.permute.xlu1 %1968  ;;  %v1964_v29 = vpop.permute.xlu0 %1963 }
 0x105   :  { %v827_v8 = vmax.f32 %v795_v60, %v3990_v20  ;;  %v1595_v58 = vmax.f32 %v1563_v23, %v3992_v36  ;;  %v1245_v37 = vmax.f32 %v3993_v31, %v1213_v48  ;;  %v1276_v53 = vmax.f32 %v1244_v55, %v3986_v22  ;;  %v3996_v22 = vld [vmem:[#allocation123_spill] sm:$0xff]  ;;  %v3997_v55 = vld [vmem:[#allocation126_spill] sm:$0xff] }
 0x106   :  { %v667_v7 = vmax.f32 %v506_v3, %v635_v18  ;;  %v1946_v1 = vunpack.i.h.bf16 %v1944_v30  ;;  %v1945_v28 = vunpack.i.l.bf16 %v1944_v30  ;;  %v1961_v45 = vunpack.i.h.bf16 %v1959_v44  ;;  %v4000_v48 = vld [vmem:[#allocation127_spill] sm:$0xff] }
 0x107   :  { %v1960_v21 = vunpack.i.l.bf16 %v1959_v44  ;;  %v1676_v38 = vadd.f32 %v1675_v49, %v1674_v17  ;;  %v1627_v63 = vmul.f32 %v1595_v58, %v827_v8  ;;  %v1436_v14 = vmax.f32 %v1276_v53, %v1404_v25  ;;  %v4001_v8 = vld [vmem:[#allocation38_spill] sm:$0xff] }
 0x108   :  { %v796_v4 = vmax.f32 %v667_v7, %v3994_v34  ;;  %v1214_v5 = vsel %vm422_vm2, 0.0, %v1946_v1  ;;  %v444_v9 = vsel %vm422_vm2, 0.0, %v1945_v28  ;;  %v507_v39 = vmax.f32 %v475_v56, %v3990_v20  ;;  %v4002_v56 = vld [vmem:[#allocation128_spill] sm:$0xff] }
 0x109   :  { %v636_v10 = vsel %vm615_vm3, %v1960_v21, 0.0  ;;  %v1677_v57 = vsel %vm1641_vm4, %v1627_v63, 0.0  ;;  %v1564_v52 = vmax.f32 %v1436_v14, %v3996_v22  ;;  %v1405_v61 = vsel %vm615_vm3, %v1961_v45, 0.0 }
 0x10a   :  { %v828_v0 = vmax.f32 %v796_v4, %v3995_v26  ;;  %v1246_v40 = vmax.f32 %v3997_v55, %v1214_v5  ;;  %v476_v30 = vmax.f32 %v3998_v62, %v444_v9  ;;  %v668_v54 = vmax.f32 %v507_v39, %v636_v10  ;;  %v4004_v39 = vld [vmem:[#allocation39_spill] sm:$0xff] }
 0x10b   :  { %v1277_v35 = vmax.f32 %v1245_v37, %v3992_v36  ;;  %v1596_v19 = vmax.f32 %v1564_v52, %v3999_v46  ;;  %v1956_v17 = vunpack.i.h.bf16 %v1954_v51  ;;  %v1955_v50 = vunpack.i.l.bf16 %v1954_v51  ;;  %v4003_v36 = vld [vmem:[#allocation40_spill] sm:$0xff]  ;;  %v1979_v37 = vpop.permute.xlu1 %1978  ;;  %v1974_v52 = vpop.permute.xlu0 %1973 }
 0x10c   :  { %v1971_v24 = vunpack.i.h.bf16 %v1969_v47  ;;  %v1678_v60 = vadd.f32 %v1677_v57, %v1676_v38  ;;  %v797_v44 = vmax.f32 %v668_v54, %v4000_v48  ;;  %v1970_v23 = vunpack.i.l.bf16 %v1969_v47  ;;  %v4005_v57 = vld [vmem:[#allocation129_spill] sm:$0xff] }
 0x10d   :  { %v1437_v27 = vmax.f32 %v1277_v35, %v1405_v61  ;;  %v1628_v25 = vmul.f32 %v1596_v19, %v828_v0  ;;  %v1215_v3 = vsel %vm422_vm2, 0.0, %v1956_v17  ;;  %v445_v49 = vsel %vm422_vm2, 0.0, %v1955_v50 }
 0x10e   :  { %v508_v20 = vmax.f32 %v476_v30, %v3995_v26  ;;  %v829_v13 = vmax.f32 %v797_v44, %v4001_v8  ;;  %v477_v58 = vmax.f32 %v4003_v36, %v445_v49  ;;  %v1406_v31 = vsel %vm615_vm3, %v1971_v24, 0.0 }
 0x10f   :  { %v1565_v18 = vmax.f32 %v1437_v27, %v4002_v56  ;;  %v1679_v7 = vsel %vm1641_vm4, %v1628_v25, 0.0  ;;  %v637_v53 = vsel %vm615_vm3, %v1970_v23, 0.0  ;;  %v1278_v1 = vmax.f32 %v1246_v40, %v3999_v46  ;;  %v1989_v46 = vpop.permute.xlu1 %1988 }
 0x110   :  { %v1966_v28 = vunpack.i.h.bf16 %v1964_v29  ;;  %v1247_v21 = vmax.f32 %v3067_v2, %v1215_v3  ;;  %v669_v51 = vmax.f32 %v508_v20, %v637_v53  ;;  %v1965_v38 = vunpack.i.l.bf16 %v1964_v29  ;;  %v4009_v53 = vld [vmem:[#allocation45_spill] sm:$0xff] }
 0x111   :  { %v1597_v45 = vmax.f32 %v1565_v18, %v3890_v59  ;;  %v1438_v63 = vmax.f32 %v1278_v1, %v1406_v31  ;;  %v1981_v4 = vunpack.i.h.bf16 %v1979_v37  ;;  %v1980_v14 = vunpack.i.l.bf16 %v1979_v37 }
 0x112   :  { %v1216_v34 = vsel %vm422_vm2, 0.0, %v1966_v28  ;;  %v1680_v5 = vadd.f32 %v1679_v7, %v1678_v60  ;;  %v798_v10 = vmax.f32 %v669_v51, %v4004_v39  ;;  %v446_v47 = vsel %vm422_vm2, 0.0, %v1965_v38  ;;  %v4010_v51 = vld [vmem:[#allocation46_spill] sm:$0xff] }
 0x113   :  { %v1629_v9 = vmul.f32 %v1597_v45, %v829_v13  ;;  %v1566_v26 = vmax.f32 %v1438_v63, %v4005_v57  ;;  %v1248_v0 = vmax.f32 %v3073_v16, %v1216_v34  ;;  %v1407_v22 = vsel %vm615_vm3, %v1981_v4, 0.0 }
 0x114   :  { %v509_v2 = vmax.f32 %v477_v58, %v4001_v8  ;;  %v830_v55 = vmax.f32 %v798_v10, %v3893_v41  ;;  %v638_v40 = vsel %vm615_vm3, %v1980_v14, 0.0  ;;  %v1279_v62 = vmax.f32 %v1247_v21, %v3890_v59  ;;  %v1984_v58 = vpop.permute.xlu0 %1983 }
 0x115   :  { %v1681_v61 = vsel %vm1641_vm4, %v1629_v9, 0.0  ;;  %v1598_v30 = vmax.f32 %v1566_v26, %v3896_v33  ;;  %v478_v54 = vmax.f32 %v3069_v11, %v446_v47  ;;  %v1061_v16 = vsel %vm197_vm5, 0.0, %v1005_v12  ;;  %v1999_v26 = vpop.permute.xlu1 %1998 }
 0x116   :  { %v670_v35 = vmax.f32 %v509_v2, %v638_v40  ;;  %v1439_v19 = vmax.f32 %v1279_v62, %v1407_v22  ;;  %v4006_v17 = vmax.f32 %v3890_v59, 0.0  ;;  %v1976_v24 = vunpack.i.h.bf16 %v1974_v52 }
 0x117   :  { %v1975_v60 = vunpack.i.l.bf16 %v1974_v52  ;;  %v1682_v48 = vadd.f32 %v1681_v61, %v1680_v5  ;;  %v1630_v44 = vmul.f32 %v1598_v30, %v830_v55  ;;  %v4007_v23 = vrot.slane %v3893_v41, 1 }
 0x118   :  { %v1089_v50 = vmax.f32 %v4006_v17, %v1061_v16  ;;  %v799_v27 = vmax.f32 %v670_v35, %v3078_v6  ;;  %v1567_v29 = vmax.f32 %v1439_v19, %v3085_v42  ;;  %v1217_v25 = vsel %vm422_vm2, 0.0, %v1976_v24 }
 0x119   :  { %v772_v11 = vsel %vm680_vm13, %v4007_v23, 0.0  ;;  %v447_v3 = vsel %vm422_vm2, 0.0, %v1975_v60  ;;  %v1991_v49 = vunpack.i.h.bf16 %v1989_v46  ;;  %v1683_v59 = vsel %vm1641_vm4, %v1630_v44, 0.0 }
 0x11a   :  { %v831_v20 = vmax.f32 %v799_v27, %v3897_v32  ;;  %v1249_v8 = vmax.f32 %v1089_v50, %v1217_v25  ;;  %v4008_v13 = vrot.slane %v3896_v33, 1  ;;  %v1599_v56 = vmax.f32 %v1567_v29, %v3912_v43  ;;  %v1994_v27 = vpop.permute.xlu0 %1993 }
 0x11b   :  { %v479_v18 = vmax.f32 %v3094_v15, %v447_v3  ;;  %v1408_v42 = vsel %vm615_vm3, %v1991_v49, 0.0  ;;  %v1990_v36 = vunpack.i.l.bf16 %v1989_v46  ;;  %v510_v31 = vmax.f32 %v478_v54, %v3893_v41 }
 0x11c   :  { %v1540_v6 = vsel %vm680_vm13, %v4008_v13, 0.0  ;;  %v1280_v37 = vmax.f32 %v1248_v0, %v3896_v33  ;;  %v158_v7 = vmax.f32 %v3893_v41, 0.0  ;;  %v235_v1 = vrot.slane %v4009_v53, 7 }
 0x11d   :  { %v1631_v28 = vmul.f32 %v1599_v56, %v831_v20  ;;  %v639_v45 = vsel %vm615_vm3, %v1990_v36, 0.0  ;;  %v930_v21 = vmax.f32 %v3896_v33, 0.0  ;;  %v1006_v38 = vrot.slane %v4010_v51, 7  ;;  %v4013_v20 = vld [vmem:[#allocation49_spill] sm:$0xff] }
 0x11e   :  { %v671_v15 = vmax.f32 %v510_v31, %v639_v45  ;;  %v1440_v63 = vmax.f32 %v1280_v37, %v1408_v42  ;;  %v4011_v34 = vrot.slane %v3897_v32, 7  ;;  %v1986_v14 = vunpack.i.h.bf16 %v1984_v58 }
 0x11f   :  { %v1684_v5 = vadd.f32 %v1683_v59, %v1682_v48  ;;  %v1685_v9 = vsel %vm1641_vm4, %v1631_v28, 0.0  ;;  %v1007_v41 = vsel %vm197_vm5, %v1005_v12, %v1006_v38  ;;  %v1985_v39 = vunpack.i.l.bf16 %v1984_v58  ;;  %v4012_v48 = vld [vmem:[#allocation48_spill] sm:$0xff] }
 0x120   :  { %v236_v4 = vsel %vm197_vm5, %v4011_v34, %v235_v1  ;;  %v800_v10 = vmax.f32 %v671_v15, %v772_v11  ;;  %v1568_v47 = vmax.f32 %v1440_v63, %v1540_v6  ;;  %v1090_v57 = vmax.f32 %v930_v21, %v1007_v41 }
 0x121   :  { %v319_v33 = vmax.f32 %v158_v7, %v236_v4  ;;  %v1686_v0 = vadd.f32 %v1685_v9, %v1684_v5  ;;  %v1218_v22 = vsel %vm422_vm2, 0.0, %v1986_v14  ;;  %v717_v2 = vrot.slane %v3897_v32, 1  ;;  %v2004_v14 = vpop.permute.xlu0 %2003 }
 0x122   :  { %v718_v52 = vrot.slane %v4009_v53, 1  ;;  %v832_v61 = vmax.f32 %v800_v10, %v4009_v53  ;;  %v1600_v55 = vmax.f32 %v1568_v47, %v4010_v51  ;;  %v1250_v40 = vmax.f32 %v1090_v57, %v1218_v22 }
 0x123   :  { %v448_v12 = vsel %vm422_vm2, 0.0, %v1985_v39  ;;  %v1485_v30 = vrot.slane %v3912_v43, 1  ;;  %v1486_v54 = vrot.slane %v4010_v51, 1  ;;  %v2001_v35 = vunpack.i.h.bf16 %v1999_v26  ;;  %v4014_v39 = vld [vmem:[#allocation51_spill] sm:$0xff] }
 0x124   :  { %v719_v62 = vsel %vm680_vm13, %v717_v2, %v718_v52  ;;  %v1632_v16 = vmul.f32 %v1600_v55, %v832_v61  ;;  %v2000_v46 = vunpack.i.l.bf16 %v1999_v26  ;;  %v511_v19 = vmax.f32 %v479_v18, %v3897_v32  ;;  %v2009_v18 = vpop.permute.xlu1 %2008  ;;  %v4015_v26 = vld [vmem:[#allocation52_spill] sm:$0xff] }
 0x125   :  { %v1281_v17 = vmax.f32 %v1249_v8, %v3912_v43  ;;  %v1487_v50 = vsel %vm680_vm13, %v1485_v30, %v1486_v54  ;;  %v1409_v24 = vsel %vm615_vm3, %v2001_v35, 0.0  ;;  %v159_v60 = vmax.f32 %v3897_v32, 0.0 }
 0x126   :  { %v237_v44 = vrot.slane %v4012_v48, 7  ;;  %v1687_v23 = vsel %vm1641_vm4, %v1632_v16, 0.0  ;;  %v640_v11 = vsel %vm615_vm3, %v2000_v46, 0.0  ;;  %v931_v25 = vmax.f32 %v3912_v43, 0.0 }
 0x127   :  { %v1441_v29 = vmax.f32 %v1281_v17, %v1409_v24  ;;  %v480_v3 = vmax.f32 %v319_v33, %v448_v12  ;;  %v672_v49 = vmax.f32 %v511_v19, %v640_v11  ;;  %v1008_v8 = vrot.slane %v4013_v20, 7 }
 0x128   :  { %v291_v59 = vsel %vm197_vm5, 0.0, %v237_v44  ;;  %v1996_v56 = vunpack.i.h.bf16 %v1994_v27  ;;  %v1995_v32 = vunpack.i.l.bf16 %v1994_v27  ;;  %v1688_v42 = vadd.f32 %v1687_v23, %v1686_v0 }
 0x129   :  { %v1569_v13 = vmax.f32 %v1441_v29, %v1487_v50  ;;  %v320_v6 = vmax.f32 %v159_v60, %v291_v59  ;;  %v801_v36 = vmax.f32 %v672_v49, %v719_v62  ;;  %v1062_v58 = vsel %vm197_vm5, 0.0, %v1008_v8  ;;  %v2019_v62 = vpop.permute.xlu1 %2018 }
 0x12a   :  { %v773_v31 = vsel %vm680_vm13, %v718_v52, 0.0  ;;  %v1091_v43 = vmax.f32 %v931_v25, %v1062_v58  ;;  %v449_v7 = vsel %vm422_vm2, 0.0, %v1995_v32  ;;  %v1541_v1 = vsel %vm680_vm13, %v1486_v54, 0.0  ;;  %v4016_v32 = vld [vmem:[#allocation54_spill] sm:$0xff] }
 0x12b   :  { %v1601_v37 = vmax.f32 %v1569_v13, %v4013_v20  ;;  %v833_v28 = vmax.f32 %v801_v36, %v4012_v48  ;;  %v1219_v45 = vsel %vm422_vm2, 0.0, %v1996_v56  ;;  %v2011_v21 = vunpack.i.h.bf16 %v2009_v18 }
 0x12c   :  { %v2010_v38 = vunpack.i.l.bf16 %v2009_v18  ;;  %v481_v15 = vmax.f32 %v320_v6, %v449_v7  ;;  %v512_v63 = vmax.f32 %v480_v3, %v4009_v53  ;;  %v1282_v34 = vmax.f32 %v1250_v40, %v4010_v51 }
 0x12d   :  { %v160_v4 = vmax.f32 %v4009_v53, 0.0  ;;  %v1633_v5 = vmul.f32 %v1601_v37, %v833_v28  ;;  %v1410_v9 = vsel %vm615_vm3, %v2011_v21, 0.0  ;;  %v238_v10 = vrot.slane %v4014_v39, 7 }
 0x12e   :  { %v641_v41 = vsel %vm615_vm3, %v2010_v38, 0.0  ;;  %v1442_v33 = vmax.f32 %v1282_v34, %v1410_v9  ;;  %v932_v57 = vmax.f32 %v4010_v51, 0.0  ;;  %v1009_v0 = vrot.slane %v4015_v26, 7 }
 0x12f   :  { %v673_v47 = vmax.f32 %v512_v63, %v641_v41  ;;  %v1689_v22 = vsel %vm1641_vm4, %v1633_v5, 0.0  ;;  %v239_v2 = vsel %vm197_vm5, %v237_v44, %v238_v10  ;;  %v2006_v52 = vunpack.i.h.bf16 %v2004_v14 }
 0x130   :  { %v2005_v53 = vunpack.i.l.bf16 %v2004_v14  ;;  %v1251_v61 = vmax.f32 %v1091_v43, %v1219_v45  ;;  %v1570_v40 = vmax.f32 %v1442_v33, %v1541_v1  ;;  %v321_v12 = vmax.f32 %v160_v4, %v239_v2  ;;  %v2029_v45 = vpop.permute.xlu1 %2028 }
 0x131   :  { %v802_v55 = vmax.f32 %v673_v47, %v773_v31  ;;  %v1010_v30 = vsel %vm197_vm5, %v1008_v8, %v1009_v0  ;;  %v1220_v54 = vsel %vm422_vm2, 0.0, %v2006_v52  ;;  %v720_v51 = vrot.slane %v4012_v48, 1  ;;  %v2014_v8 = vpop.permute.xlu0 %2013  ;;  %v4017_v31 = vld [vmem:[#allocation55_spill] sm:$0xff] }
 0x132   :  { %v450_v35 = vsel %vm422_vm2, 0.0, %v2005_v53  ;;  %v3492_v16 = vadd.f32 %v1689_v22, %v1688_v42  ;;  %v1602_v19 = vmax.f32 %v1570_v40, %v4015_v26  ;;  %v1092_v17 = vmax.f32 %v932_v57, %v1010_v30  ;;  %v4018_v53 = vld [vmem:[#allocation57_spill] sm:$0xff] }
 0x133   :  { %v834_v46 = vmax.f32 %v802_v55, %v4014_v39  ;;  %v721_v50 = vrot.slane %v4014_v39, 1  ;;  %v1488_v24 = vrot.slane %v4013_v20, 1  ;;  %v1489_v60 = vrot.slane %v4015_v26, 1 }
 0x134   :  { %v2021_v44 = vunpack.i.h.bf16 %v2019_v62  ;;  %v1252_v23 = vmax.f32 %v1092_v17, %v1220_v54  ;;  %v482_v11 = vmax.f32 %v321_v12, %v450_v35  ;;  %v2020_v29 = vunpack.i.l.bf16 %v2019_v62  ;;  %v4019_v62 = vld [vmem:[#allocation58_spill] sm:$0xff] }
 0x135   :  { %v1634_v27 = vmul.f32 %v1602_v19, %v834_v46  ;;  %v722_v25 = vsel %vm680_vm13, %v720_v51, %v721_v50  ;;  %v513_v49 = vmax.f32 %v481_v15, %v4012_v48  ;;  %v1283_v59 = vmax.f32 %v1251_v61, %v4013_v20  ;;  %v2024_v0 = vpop.permute.xlu0 %2023 }
 0x136   :  { %v1411_v3 = vsel %vm615_vm3, %v2021_v44, 0.0  ;;  %v1490_v13 = vsel %vm680_vm13, %v1488_v24, %v1489_v60  ;;  %v642_v6 = vsel %vm615_vm3, %v2020_v29, 0.0  ;;  %v161_v56 = vmax.f32 %v4012_v48, 0.0  ;;  %v2039_v24 = vpop.permute.xlu1 %2038 }
 0x137   :  { %v240_v18 = vrot.slane %v4016_v32, 7  ;;  %v674_v42 = vmax.f32 %v513_v49, %v642_v6  ;;  %v1443_v36 = vmax.f32 %v1283_v59, %v1411_v3  ;;  %v933_v58 = vmax.f32 %v4013_v20, 0.0 }
 0x138   :  { %v1011_v37 = vrot.slane %v4017_v31, 7  ;;  %v3510_v43 = vsel %vm1641_vm4, %v1634_v27, 0.0  ;;  %v2016_v1 = vunpack.i.h.bf16 %v2014_v8  ;;  %v2015_v28 = vunpack.i.l.bf16 %v2014_v8 }
 0x139   :  { %v292_v7 = vsel %vm197_vm5, 0.0, %v240_v18  ;;  %v803_v21 = vmax.f32 %v674_v42, %v722_v25  ;;  %v1571_v38 = vmax.f32 %v1443_v36, %v1490_v13  ;;  %v774_v4 = vsel %vm680_vm13, %v721_v50, 0.0  ;;  %v2034_v42 = vpop.permute.xlu0 %2033 }
 0x13a   :  { %v322_v15 = vmax.f32 %v161_v56, %v292_v7  ;;  %v1063_v48 = vsel %vm197_vm5, 0.0, %v1011_v37  ;;  %v1221_v34 = vsel %vm422_vm2, 0.0, %v2016_v1  ;;  %v451_v20 = vsel %vm422_vm2, 0.0, %v2015_v28 }
 0x13b   :  { %v1093_v63 = vmax.f32 %v933_v58, %v1063_v48  ;;  %v835_v14 = vmax.f32 %v803_v21, %v4016_v32  ;;  %v1603_v5 = vmax.f32 %v1571_v38, %v4017_v31  ;;  %v1542_v9 = vsel %vm680_vm13, %v1489_v60, 0.0  ;;  %v4021_v48 = vld [vmem:[#allocation62_spill] sm:$0xff] }
 0x13c   :  { %v2031_v41 = vunpack.i.h.bf16 %v2029_v45  ;;  %v483_v47 = vmax.f32 %v322_v15, %v451_v20  ;;  %v2030_v33 = vunpack.i.l.bf16 %v2029_v45  ;;  %v1284_v57 = vmax.f32 %v1252_v23, %v4015_v26  ;;  %v4020_v45 = vld [vmem:[#allocation61_spill] sm:$0xff] }
 0x13d   :  { %v1253_v10 = vmax.f32 %v1093_v63, %v1221_v34  ;;  %v514_v2 = vmax.f32 %v482_v11, %v4014_v39  ;;  %v162_v52 = vmax.f32 %v4014_v39, 0.0  ;;  %v241_v61 = vrot.slane %v4018_v53, 7 }
 0x13e   :  { %v1412_v22 = vsel %vm615_vm3, %v2031_v41, 0.0  ;;  %v643_v55 = vsel %vm615_vm3, %v2030_v33, 0.0  ;;  %v934_v12 = vmax.f32 %v4015_v26, 0.0  ;;  %v1012_v30 = vrot.slane %v4019_v62, 7 }
 0x13f   :  { %v1444_v40 = vmax.f32 %v1284_v57, %v1412_v22  ;;  %v675_v54 = vmax.f32 %v514_v2, %v643_v55  ;;  %v242_v35 = vsel %vm197_vm5, %v240_v18, %v241_v61  ;;  %v2026_v51 = vunpack.i.h.bf16 %v2024_v0 }
 0x140   :  { %v2025_v46 = vunpack.i.l.bf16 %v2024_v0  ;;  %v323_v17 = vmax.f32 %v162_v52, %v242_v35  ;;  %v1013_v50 = vsel %vm197_vm5, %v1011_v37, %v1012_v30  ;;  %v723_v39 = vrot.slane %v4016_v32, 1 }
 0x141   :  { %v1572_v19 = vmax.f32 %v1444_v40, %v1542_v9  ;;  %v804_v60 = vmax.f32 %v675_v54, %v774_v4  ;;  %v1094_v44 = vmax.f32 %v934_v12, %v1013_v50  ;;  %v1222_v27 = vsel %vm422_vm2, 0.0, %v2026_v51  ;;  %v2049_v4 = vpop.permute.xlu1 %2048  ;;  %v2044_v40 = vpop.permute.xlu0 %2043  ;;  %v4023_v50 = vld [vmem:[#allocation64_spill] sm:$0xff] }
 0x142   :  { %v452_v26 = vsel %vm422_vm2, 0.0, %v2025_v46  ;;  %v3533_v23 = vmul.f32 %v1603_v5, %v835_v14  ;;  %v724_v29 = vrot.slane %v4018_v53, 1  ;;  %v1491_v25 = vrot.slane %v4017_v31, 1  ;;  %v4022_v46 = vld [vmem:[#allocation63_spill] sm:$0xff] }
 0x143   :  { %v1604_v11 = vmax.f32 %v1572_v19, %v4019_v62  ;;  %v836_v3 = vmax.f32 %v804_v60, %v4018_v53  ;;  %v484_v49 = vmax.f32 %v323_v17, %v452_v26  ;;  %v1492_v59 = vrot.slane %v4019_v62, 1 }
 0x144   :  { %v2041_v8 = vunpack.i.h.bf16 %v2039_v24  ;;  %v1254_v13 = vmax.f32 %v1094_v44, %v1222_v27  ;;  %v725_v6 = vsel %vm680_vm13, %v723_v39, %v724_v29  ;;  %v2040_v56 = vunpack.i.l.bf16 %v2039_v24 }
 0x145   :  { %v1285_v18 = vmax.f32 %v1253_v10, %v4017_v31  ;;  %v1493_v36 = vsel %vm680_vm13, %v1491_v25, %v1492_v59  ;;  %v515_v37 = vmax.f32 %v483_v47, %v4016_v32  ;;  %v163_v7 = vmax.f32 %v4016_v32, 0.0 }
 0x146   :  { %v1413_v58 = vsel %vm615_vm3, %v2041_v8, 0.0  ;;  %v644_v1 = vsel %vm615_vm3, %v2040_v56, 0.0  ;;  %v243_v21 = vrot.slane %v4020_v45, 7  ;;  %v935_v38 = vmax.f32 %v4017_v31, 0.0  ;;  %v2059_v8 = vpop.permute.xlu1 %2058 }
 0x147   :  { %v1445_v28 = vmax.f32 %v1285_v18, %v1413_v58  ;;  %v676_v15 = vmax.f32 %v515_v37, %v644_v1  ;;  %v1014_v63 = vrot.slane %v4021_v48, 7  ;;  %v2036_v34 = vunpack.i.h.bf16 %v2034_v42  ;;  %v2054_v18 = vpop.permute.xlu0 %2053 }
 0x148   :  { %v2035_v20 = vunpack.i.l.bf16 %v2034_v42  ;;  %v3550_v14 = vmul.f32 %v1604_v11, %v836_v3  ;;  %v293_v9 = vsel %vm197_vm5, 0.0, %v243_v21  ;;  %v775_v32 = vsel %vm680_vm13, %v724_v29, 0.0 }
 0x149   :  { %v3552_v5 = vmax.f32 %v1445_v28, %v1493_v36  ;;  %v3556_v41 = vmax.f32 %v676_v15, %v725_v6  ;;  %v324_v10 = vmax.f32 %v163_v7, %v293_v9  ;;  %v1064_v47 = vsel %vm197_vm5, 0.0, %v1014_v63 }
 0x14a   :  { %v1543_v31 = vsel %vm680_vm13, %v1492_v59, 0.0  ;;  %v1223_v57 = vsel %vm422_vm2, 0.0, %v2036_v34  ;;  %v453_v0 = vsel %vm422_vm2, 0.0, %v2035_v20  ;;  %v2051_v22 = vunpack.i.h.bf16 %v2049_v4 }
 0x14b   :  { %v1605_v33 = vmax.f32 %v3552_v5, %v4021_v48  ;;  %v837_v2 = vmax.f32 %v3556_v41, %v4020_v45  ;;  %v1095_v52 = vmax.f32 %v935_v38, %v1064_v47  ;;  %v485_v61 = vmax.f32 %v324_v10, %v453_v0 }
 0x14c   :  { %v2050_v55 = vunpack.i.l.bf16 %v2049_v4  ;;  %v1414_v12 = vsel %vm615_vm3, %v2051_v22, 0.0  ;;  %v516_v30 = vmax.f32 %v484_v49, %v4018_v53  ;;  %v1286_v54 = vmax.f32 %v1254_v13, %v4019_v62 }
 0x14d   :  { %v164_v35 = vmax.f32 %v4018_v53, 0.0  ;;  %v244_v19 = vrot.slane %v4022_v46, 7  ;;  %v936_v17 = vmax.f32 %v4019_v62, 0.0  ;;  %v1015_v39 = vrot.slane %v4023_v50, 7 }
 0x14e   :  { %v645_v51 = vsel %vm615_vm3, %v2050_v55, 0.0  ;;  %v1446_v60 = vmax.f32 %v1286_v54, %v1414_v12  ;;  %v2046_v44 = vunpack.i.h.bf16 %v2044_v40  ;;  %v2045_v27 = vunpack.i.l.bf16 %v2044_v40 }
 0x14f   :  { %v677_v24 = vmax.f32 %v516_v30, %v645_v51  ;;  %v245_v26 = vsel %vm197_vm5, %v243_v21, %v244_v19  ;;  %v1016_v11 = vsel %vm197_vm5, %v1014_v63, %v1015_v39  ;;  %v727_v29 = vrot.slane %v4022_v46, 1 }
 0x150   :  { %v1495_v53 = vrot.slane %v4023_v50, 1  ;;  %v1255_v25 = vmax.f32 %v1095_v52, %v1223_v57  ;;  %v325_v49 = vmax.f32 %v164_v35, %v245_v26  ;;  %v1096_v59 = vmax.f32 %v936_v17, %v1016_v11 }
 0x151   :  { %v806_v3 = vmax.f32 %v677_v24, %v775_v32  ;;  %v1574_v62 = vmax.f32 %v1446_v60, %v1543_v31  ;;  %v1224_v13 = vsel %vm422_vm2, 0.0, %v2046_v44  ;;  %v454_v6 = vsel %vm422_vm2, 0.0, %v2045_v27 }
 0x152   :  { %v776_v56 = vsel %vm680_vm13, %v727_v29, 0.0  ;;  %v1256_v36 = vmax.f32 %v1096_v59, %v1224_v13  ;;  %v486_v58 = vmax.f32 %v325_v49, %v454_v6  ;;  %v1544_v37 = vsel %vm680_vm13, %v1495_v53, 0.0 }
 0x153   :  { %v838_v42 = vmax.f32 %v806_v3, %v4022_v46  ;;  %v2061_v7 = vunpack.i.h.bf16 %v2059_v8  ;;  %v2060_v1 = vunpack.i.l.bf16 %v2059_v8  ;;  %v726_v28 = vrot.slane %v4020_v45, 1 }
 0x154   :  { %v1494_v21 = vrot.slane %v4021_v48, 1  ;;  %v518_v38 = vmax.f32 %v486_v58, %v4022_v46  ;;  %v1288_v15 = vmax.f32 %v1256_v36, %v4023_v50  ;;  %v2056_v63 = vunpack.i.h.bf16 %v2054_v18 }
 0x155   :  { %v2055_v34 = vunpack.i.l.bf16 %v2054_v18  ;;  %v1606_v20 = vmax.f32 %v1574_v62, %v4023_v50  ;;  %v1416_v4 = vsel %vm615_vm3, %v2061_v7, 0.0  ;;  %v647_v5 = vsel %vm615_vm3, %v2060_v1, 0.0 }
 0x156   :  { %v728_v9 = vsel %vm680_vm13, %v726_v28, %v727_v29  ;;  %v679_v32 = vmax.f32 %v518_v38, %v647_v5  ;;  %v1448_v41 = vmax.f32 %v1288_v15, %v1416_v4  ;;  %v1415_v10 = vsel %vm615_vm3, %v2056_v63, 0.0 }
 0x157   :  { %v517_v47 = vmax.f32 %v485_v61, %v4020_v45  ;;  %v1496_v31 = vsel %vm680_vm13, %v1494_v21, %v1495_v53  ;;  %v646_v57 = vsel %vm615_vm3, %v2055_v34, 0.0  ;;  %v1287_v0 = vmax.f32 %v1255_v25, %v4021_v48 }
 0x158   :  { %v1637_v22 = vmul.f32 %v1605_v33, %v837_v2  ;;  %v808_v52 = vmax.f32 %v679_v32, %v776_v56  ;;  %v1576_v55 = vmax.f32 %v1448_v41, %v1544_v37  ;;  %v1692_v12 = vadd.f32 %v3510_v43, %v3492_v16 }
 0x159   :  { %v678_v40 = vmax.f32 %v517_v47, %v646_v57  ;;  %v1447_v30 = vmax.f32 %v1287_v0, %v1415_v10  ;;  %v1638_v54 = vmul.f32 %v1606_v20, %v838_v42  ;;  %v1693_v35 = vsel %vm1641_vm4, %v3533_v23, 0.0 }
 0x15a   :  { %v1695_v45 = vsel %vm1641_vm4, %v3550_v14, 0.0  ;;  %v1694_v51 = vadd.f32 %v1693_v35, %v1692_v12  ;;  %v840_v46 = vmax.f32 %v808_v52, 0.0  ;;  %v1608_v19 = vmax.f32 %v1576_v55, 0.0 }
 0x15b   :  { %v807_v61 = vmax.f32 %v678_v40, %v728_v9  ;;  %v1575_v48 = vmax.f32 %v1447_v30, %v1496_v31  ;;  %v1697_v33 = vsel %vm1641_vm4, %v1637_v22, 0.0  ;;  %v1699_v16 = vsel %vm1641_vm4, %v1638_v54, 0.0 }
 0x15c   :  { %v1696_v17 = vadd.f32 %v1695_v45, %v1694_v51  ;;  %v1640_v24 = vmul.f32 %v1608_v19, %v840_v46 }
 0x15d   :  { %v839_v2 = vmax.f32 %v807_v61, 0.0  ;;  %v1607_v50 = vmax.f32 %v1575_v48, 0.0 }
 0x15e   :  { %v1698_v43 = vadd.f32 %v1697_v33, %v1696_v17  ;;  %v1703_v14 = vsel %vm1641_vm4, %v1640_v24, 0.0 }
 0x15f   :  { %v1639_v39 = vmul.f32 %v1607_v50, %v839_v2 }
 0x160   :  { %v1700_v60 = vadd.f32 %v1699_v16, %v1698_v43 }
 0x161   :  { %v1701_v23 = vsel %vm1641_vm4, %v1639_v39, 0.0 }
 0x162   :  { %v1702_v44 = vadd.f32 %v1701_v23, %v1700_v60 }
 0x164   :  { %v1704_v27 = vadd.f32 %v1703_v14, %v1702_v44 }
 0x166   :  { %1705 = vadd.xlane.f32.xlu0 %v1704_v27 }
 0x1f3   :  { %v1706_v26 = vpop.xlane.xlu0 %1705 }
 0x1f4   :  { %v1707_v11 = vrot.slane %v1706_v26, 4 }
 0x1f6   :  { %v1708_v29 = vadd.f32 %v1707_v11, %v1706_v26 }
 0x1f8   :  { %v1709_v53 = vrot.slane %v1708_v29, 2 }
 0x1fa   :  { %v1710_v25 = vadd.f32 %v1709_v53, %v1708_v29 }
 0x1fc   :  { %v1711_v3 = vrot.slane %v1710_v25, 1 }
 0x1fe   :  { %v1712_v49 = vadd.f32 %v1711_v3, %v1710_v25 }
 0x200   :  { %1732 = vpush %v1712_v49 }
 0x231   :  { %s1733_s7 = spop %1732 }
 0x232   :  { %1715 = sst [smem:[#allocation7]] %s1733_s7 }
 0x233   :  { %2103 = shalt.err (!%p2100_p13)
}
 0x234   :  { %s2117_s15 = smov [#allocation7]  }
 0x235   :  { %1723 = dma.smem_to_hbm %s2117_s15, 16, %s3620_s2, [#allocation5]  }
 0x236   :  { %2108 = dma.done.wait [#allocation5], 16  }
 0x237   :  { %2109 = vsyncadd [#allocation5], 4294967280 }
 0x238   :  { %1727 = sfence }
 0x239   :  { %1728 = vsyncpa [#allocation3], 1 }
 0x23a   :  { %1729 = vsyncpa [#allocation4], 1 }
 0x23b   :  { %1730 = vsyncpa [#allocation5], 1 }

</bundles_post_ra>
